<compile_context>
chip_gen: v5e
topology: v5e:2x2
jax: 0.10.0
libtpu: 0.0.40
codegen_flags: <defaults>
</compile_context>

<pallas_src>
import functools

import jax
import jax.numpy as jnp
from jax.experimental import pallas as pl
from jax.experimental.pallas import tpu as pltpu


def _round_up(a: int, b: int) -> int:
    return (a + b - 1) // b * b


def _choose_tile_n(n: int, requested: int) -> int:
    """Batch tile: multiple of 128, <= requested, and -- when the batch is big
    enough -- chosen so the grid has an even number of >= 2 steps, giving both
    v7x TensorCores balanced work via the 'parallel' grid axis."""
    n128 = _round_up(n, 128)
    t = _round_up(max(128, min(requested, n128)), 128)
    if n128 >= 2 * 128:
        pairs = _round_up(n128, 2 * t) // (2 * t)        # target grid = 2 * pairs
        t = _round_up(pl.cdiv(n128, 2 * pairs), 128)
    return t


def instant_nerf_mlp_kernel(x_ref, w_in_ref, b_in_ref, w_h_ref, b_h_ref,
                            w_out_ref, b_out_ref, oT_ref, *,
                            num_hidden_layer, precision):
    """Feature-major MLP body: activations are (feat, tile_n), batch on lanes."""
    compute_dtype = w_in_ref.dtype

    # fc_in: the x tile arrives batch-major (tile_n, in_dim) straight from HBM
    # (no wrapper transpose/cast launch).  Contract x's last dim against
    # w_inT's last dim so the MXU consumes it as-is and emits the feature-major
    # h (feat, tile_n).  NOTE: no activation after fc_in (matches the module).
    x = x_ref[...].astype(compute_dtype)
    h = jax.lax.dot_general(
        w_in_ref[...], x, (((1,), (1,)), ((), ())),
        preferred_element_type=jnp.float32, precision=precision)
    h = h + b_in_ref[...]

    # Hidden layers: relu(W_i @ h + b_i); statically unrolled (L is small).
    # Bias add / relu / bf16 casts are VPU filler hidden under MXU slack.
    for i in range(num_hidden_layer):
        h = jnp.dot(w_h_ref[i], h.astype(compute_dtype),
                    preferred_element_type=jnp.float32, precision=precision)
        h = jnp.maximum(h + b_h_ref[i], 0.0)

    # fc_out, feature-major: (out_dim, tile_n) keeps the batch on lanes, so the
    # output store is lane-dense and unmasked.
    outT = jnp.dot(w_out_ref[...], h.astype(compute_dtype),
                   preferred_element_type=jnp.float32, precision=precision)
    oT_ref[...] = (outT + b_out_ref[...]).astype(oT_ref.dtype)


def prepare_params(params, *, compute_dtype=jnp.bfloat16):
    """One-time conversion of torch-style params to the kernel's resident
    feature-major layout.  Hoist this out of any per-ray-batch loop: it is the
    only place the tiny weight transpose / reshape / cast launches happen."""
    in_dim, feat = params["w_in"].shape
    out_dim = params["w_out"].shape[1]
    num_hidden_layer = params["w_h"].shape[0]
    f32 = jnp.float32
    return {
        "w_inT": jnp.asarray(params["w_in"], f32).T.astype(compute_dtype),          # (feat, in)
        "b_in": jnp.asarray(params["b_in"], f32).reshape(feat, 1),                   # (feat, 1)
        "w_hT": jnp.transpose(jnp.asarray(params["w_h"], f32),
                              (0, 2, 1)).astype(compute_dtype),                      # (L, feat, feat)
        "b_h": jnp.asarray(params["b_h"], f32).reshape(num_hidden_layer, feat, 1),   # (L, feat, 1)
        "w_outT": jnp.asarray(params["w_out"], f32).T.astype(compute_dtype),         # (out, feat)
        "b_out": jnp.asarray(params["b_out"], f32).reshape(out_dim, 1),              # (out, 1)
    }


def instant_nerf_mlp(x, params, *, tile_n=8192, compute_dtype=jnp.bfloat16,
                     return_feature_major=False):
    """InstantNeRFMLP forward pass with a single Pallas TPU kernel.

    Args:
      x: (N, in_dim) batch of input feature vectors (passed batch-major,
         un-cast: the kernel consumes it directly).
      params: either prepared params from prepare_params() (recommended: call
         once and reuse) or raw torch-style params (converted on the fly).
      tile_n: requested batch tile (lane dim of every matmul); auto-capped so
         the grid has an even number of >= 2 steps.  Sweep 4096-8192.
      compute_dtype: matmul operand dtype (bf16 is MXU-native on v5e/v6e/v7x;
         accumulation is always f32).  Ignored if params are already prepared.
      return_feature_major: if True, return (out_dim, N) and skip the final
         transpose back to the module's (N, out_dim) layout.
    """
    if x.ndim != 2:
        raise ValueError(f"Expected a 2D tensor. Got {x.ndim}-D tensor.")
    if "w_inT" not in params:
        params = prepare_params(params, compute_dtype=compute_dtype)

    feat_dim, in_dim = params["w_inT"].shape
    out_dim = params["w_outT"].shape[0]
    num_hidden_layer = params["w_hT"].shape[0]
    if x.shape[-1] != in_dim:
        raise ValueError(f"Expected {in_dim}-D position vector. Got {x.shape[-1]}.")

    n = x.shape[0]
    tile = _choose_tile_n(n, tile_n)
    n_pad = _round_up(n, tile)
    x_in = x if n_pad == n else jnp.pad(x, ((0, n_pad - n), (0, 0)))

    precision = (jax.lax.Precision.HIGHEST
                 if params["w_inT"].dtype == jnp.float32 else None)
    kernel = functools.partial(instant_nerf_mlp_kernel,
                               num_hidden_layer=num_hidden_layer,
                               precision=precision)

    # Weights/biases: tiny, grid-invariant full blocks -> resident across steps.
    full = lambda shape: pl.BlockSpec(shape, lambda i: (0,) * len(shape))

    outT = pl.pallas_call(
        kernel,
        out_shape=jax.ShapeDtypeStruct((out_dim, n_pad), x.dtype),
        grid_spec=pltpu.PrefetchScalarGridSpec(
            num_scalar_prefetch=0,
            grid=(n_pad // tile,),
            in_specs=[
                pl.BlockSpec((tile, in_dim), lambda i: (i, 0)),   # batch-major x tile
                full(params["w_inT"].shape),
                full(params["b_in"].shape),
                full(params["w_hT"].shape),
                full(params["b_h"].shape),
                full(params["w_outT"].shape),
                full(params["b_out"].shape),
            ],
            out_specs=pl.BlockSpec((out_dim, tile), lambda i: (0, i)),
        ),
        compiler_params=pltpu.CompilerParams(
            dimension_semantics=("parallel",)),
    )(x_in, params["w_inT"], params["b_in"], params["w_hT"], params["b_h"],
      params["w_outT"], params["b_out"])

    if return_feature_major:
        return outT if n_pad == n else outT[:, :n]
    # Deliberate: one small (out_dim, N) transpose back to the module's layout.
    # Padded rows (bias-only garbage) are discarded by the [:n] slice.
    out = outT.T
    return out if n_pad == n else out[:n]


def init_params(key, in_dim, out_dim, feat_dim, num_hidden_layer):
    """Deterministic init mimicking torch.nn.Linear default (U[-1/sqrt(fan_in), +])."""
    ks = jax.random.split(key, 6)

    def uniform(k, shape, fan_in):
        bound = 1.0 / jnp.sqrt(jnp.float32(fan_in))
        return jax.random.uniform(k, shape, jnp.float32, -bound, bound)

    return {
        "w_in": uniform(ks[0], (in_dim, feat_dim), in_dim),
        "b_in": uniform(ks[1], (1, feat_dim), in_dim),
        "w_h": uniform(ks[2], (num_hidden_layer, feat_dim, feat_dim), feat_dim),
        "b_h": uniform(ks[3], (num_hidden_layer, feat_dim), feat_dim),
        "w_out": uniform(ks[4], (feat_dim, out_dim), feat_dim),
        "b_out": uniform(ks[5], (1, out_dim), feat_dim),
    }


def reference_forward(x, params, num_hidden_layer):
    """Pure-JAX reference matching the PyTorch forward (batch-major, f32)."""
    h = x @ params["w_in"] + params["b_in"]
    for i in range(num_hidden_layer):
        h = jnp.maximum(h @ params["w_h"][i] + params["b_h"][i], 0.0)
    return h @ params["w_out"] + params["b_out"]


if __name__ == "__main__":
    IN_DIM, OUT_DIM, FEAT_DIM, NUM_HIDDEN = 16, 4, 64, 2
    N = 2048  # auto-tiled to tile_n=1024 -> grid of 2 (even) parallel steps

    key = jax.random.PRNGKey(0)
    kx, kp, kx2 = jax.random.split(key, 3)
    x = jax.random.normal(kx, (N, IN_DIM), dtype=jnp.float32)
    params = init_params(kp, IN_DIM, OUT_DIM, FEAT_DIM, NUM_HIDDEN)
    ref = reference_forward(x, params, NUM_HIDDEN)

    # bf16-operand fast path (default on all generations; f32 accumulation).
    # Weight prep is hoisted and reused across calls.
    prep_bf16 = prepare_params(params, compute_dtype=jnp.bfloat16)
    out_bf16 = jax.block_until_ready(instant_nerf_mlp(x, prep_bf16))
    assert out_bf16.shape == (N, OUT_DIM)
    assert jnp.allclose(out_bf16, ref, atol=5e-2, rtol=5e-2)

    # f32-operand path (precision=HIGHEST inside the kernel).
    prep_f32 = prepare_params(params, compute_dtype=jnp.float32)
    out_f32 = jax.block_until_ready(instant_nerf_mlp(x, prep_f32))
    assert out_f32.shape == (N, OUT_DIM)
    assert jnp.allclose(out_f32, ref, atol=1e-4, rtol=1e-4)

    # Ragged batch: exercises the padding path and the final [:n] slice.
    N2 = 1000
    x2 = jax.random.normal(kx2, (N2, IN_DIM), dtype=jnp.float32)
    ref2 = reference_forward(x2, params, NUM_HIDDEN)
    out2 = jax.block_until_ready(instant_nerf_mlp(x2, prep_bf16))
    assert out2.shape == (N2, OUT_DIM)
    assert jnp.allclose(out2, ref2, atol=5e-2, rtol=5e-2)

    # Feature-major output option (consumer skips the wrapper transpose).
    out2_fm = jax.block_until_ready(
        instant_nerf_mlp(x2, prep_bf16, return_feature_major=True))
    assert out2_fm.shape == (OUT_DIM, N2)
    assert jnp.allclose(out2_fm.T, ref2, atol=5e-2, rtol=5e-2)

    print("KERNEL_OK")
</pallas_src>

<mosaic_0001>
module attributes {stable_mosaic.version = 11 : i64} {
  func.func @instant_nerf_mlp_kernel(%arg0: i32, %arg1: memref<1024x16xf32, #tpu.memory_space<vmem>>, %arg2: memref<64x16xbf16, #tpu.memory_space<vmem>>, %arg3: memref<64x1xf32, #tpu.memory_space<vmem>>, %arg4: memref<2x64x64xbf16, #tpu.memory_space<vmem>>, %arg5: memref<2x64x1xf32, #tpu.memory_space<vmem>>, %arg6: memref<4x64xbf16, #tpu.memory_space<vmem>>, %arg7: memref<4x1xf32, #tpu.memory_space<vmem>>, %arg8: memref<4x1024xf32, #tpu.memory_space<vmem>>) attributes {dimension_semantics = [#tpu.dimension_semantics<parallel>], iteration_bounds = array<i64: 2>, scalar_prefetch = 0 : i64, scratch_operands = 0 : i64, tpu.core_type = #tpu.core_type<tc>, window_params = [{transform_indices = @transform_0, window_bounds = array<i64: 1024, 16>}, {pipeline_mode = #tpu.pipeline_mode<synchronous>, transform_indices = @transform_1, window_bounds = array<i64: 64, 16>}, {pipeline_mode = #tpu.pipeline_mode<synchronous>, transform_indices = @transform_2, window_bounds = array<i64: 64, 1>}, {pipeline_mode = #tpu.pipeline_mode<synchronous>, transform_indices = @transform_3, window_bounds = array<i64: 2, 64, 64>}, {pipeline_mode = #tpu.pipeline_mode<synchronous>, transform_indices = @transform_4, window_bounds = array<i64: 2, 64, 1>}, {pipeline_mode = #tpu.pipeline_mode<synchronous>, transform_indices = @transform_5, window_bounds = array<i64: 4, 64>}, {pipeline_mode = #tpu.pipeline_mode<synchronous>, transform_indices = @transform_6, window_bounds = array<i64: 4, 1>}, {transform_indices = @transform_7, window_bounds = array<i64: 4, 1024>}]} {
    %c0 = arith.constant 0 : index
    %c0_0 = arith.constant 0 : index
    %0 = vector.load %arg1[%c0, %c0_0] : memref<1024x16xf32, #tpu.memory_space<vmem>>, vector<1024x16xf32>
    %1 = arith.truncf %0 : vector<1024x16xf32> to vector<1024x16xbf16>
    %c0_1 = arith.constant 0 : index
    %c0_2 = arith.constant 0 : index
    %2 = vector.load %arg2[%c0_1, %c0_2] : memref<64x16xbf16, #tpu.memory_space<vmem>>, vector<64x16xbf16>
    %cst = arith.constant dense<0.000000e+00> : vector<64x1024xf32>
    %3 = tpu.matmul %2, %1, %cst {dimension_numbers = #tpu.dot_dimension_numbers<[1], [1], [0], [0], [0, 0, 1, 0], [], []>} : vector<64x16xbf16>, vector<1024x16xbf16>, vector<64x1024xf32> -> vector<64x1024xf32>
    %c0_3 = arith.constant 0 : index
    %c0_4 = arith.constant 0 : index
    %4 = vector.load %arg3[%c0_3, %c0_4] : memref<64x1xf32, #tpu.memory_space<vmem>>, vector<64x1xf32>
    %5 = vector.broadcast %4 : vector<64x1xf32> to vector<64x1024xf32>
    %6 = arith.addf %3, %5 : vector<64x1024xf32>
    %c0_5 = arith.constant 0 : index
    %c0_6 = arith.constant 0 : index
    %c0_7 = arith.constant 0 : index
    %7 = vector.load %arg4[%c0_5, %c0_6, %c0_7] : memref<2x64x64xbf16, #tpu.memory_space<vmem>>, vector<1x64x64xbf16>
    %8 = vector.shape_cast %7 : vector<1x64x64xbf16> to vector<64x64xbf16>
    %9 = arith.truncf %6 : vector<64x1024xf32> to vector<64x1024xbf16>
    %cst_8 = arith.constant dense<0.000000e+00> : vector<64x1024xf32>
    %10 = tpu.matmul %8, %9, %cst_8 {dimension_numbers = #tpu.dot_dimension_numbers<[1], [0], [0], [1], [0, 0, 1, 1], [], []>} : vector<64x64xbf16>, vector<64x1024xbf16>, vector<64x1024xf32> -> vector<64x1024xf32>
    %c0_9 = arith.constant 0 : index
    %c0_10 = arith.constant 0 : index
    %c0_11 = arith.constant 0 : index
    %11 = vector.load %arg5[%c0_9, %c0_10, %c0_11] : memref<2x64x1xf32, #tpu.memory_space<vmem>>, vector<1x64x1xf32>
    %12 = vector.shape_cast %11 : vector<1x64x1xf32> to vector<64x1xf32>
    %13 = vector.broadcast %12 : vector<64x1xf32> to vector<64x1024xf32>
    %14 = arith.addf %10, %13 : vector<64x1024xf32>
    %cst_12 = arith.constant 0.000000e+00 : f32
    %15 = vector.broadcast %cst_12 : f32 to vector<64x1024xf32>
    %16 = arith.maximumf %14, %15 : vector<64x1024xf32>
    %c1 = arith.constant 1 : index
    %c0_13 = arith.constant 0 : index
    %c0_14 = arith.constant 0 : index
    %17 = vector.load %arg4[%c1, %c0_13, %c0_14] : memref<2x64x64xbf16, #tpu.memory_space<vmem>>, vector<1x64x64xbf16>
    %18 = vector.shape_cast %17 : vector<1x64x64xbf16> to vector<64x64xbf16>
    %19 = arith.truncf %16 : vector<64x1024xf32> to vector<64x1024xbf16>
    %cst_15 = arith.constant dense<0.000000e+00> : vector<64x1024xf32>
    %20 = tpu.matmul %18, %19, %cst_15 {dimension_numbers = #tpu.dot_dimension_numbers<[1], [0], [0], [1], [0, 0, 1, 1], [], []>} : vector<64x64xbf16>, vector<64x1024xbf16>, vector<64x1024xf32> -> vector<64x1024xf32>
    %c1_16 = arith.constant 1 : index
    %c0_17 = arith.constant 0 : index
    %c0_18 = arith.constant 0 : index
    %21 = vector.load %arg5[%c1_16, %c0_17, %c0_18] : memref<2x64x1xf32, #tpu.memory_space<vmem>>, vector<1x64x1xf32>
    %22 = vector.shape_cast %21 : vector<1x64x1xf32> to vector<64x1xf32>
    %23 = vector.broadcast %22 : vector<64x1xf32> to vector<64x1024xf32>
    %24 = arith.addf %20, %23 : vector<64x1024xf32>
    %cst_19 = arith.constant 0.000000e+00 : f32
    %25 = vector.broadcast %cst_19 : f32 to vector<64x1024xf32>
    %26 = arith.maximumf %24, %25 : vector<64x1024xf32>
    %c0_20 = arith.constant 0 : index
    %c0_21 = arith.constant 0 : index
    %27 = vector.load %arg6[%c0_20, %c0_21] : memref<4x64xbf16, #tpu.memory_space<vmem>>, vector<4x64xbf16>
    %28 = arith.truncf %26 : vector<64x1024xf32> to vector<64x1024xbf16>
    %cst_22 = arith.constant dense<0.000000e+00> : vector<4x1024xf32>
    %29 = tpu.matmul %27, %28, %cst_22 {dimension_numbers = #tpu.dot_dimension_numbers<[1], [0], [0], [1], [0, 0, 1, 1], [], []>} : vector<4x64xbf16>, vector<64x1024xbf16>, vector<4x1024xf32> -> vector<4x1024xf32>
    %c0_23 = arith.constant 0 : index
    %c0_24 = arith.constant 0 : index
    %30 = vector.load %arg7[%c0_23, %c0_24] : memref<4x1xf32, #tpu.memory_space<vmem>>, vector<4x1xf32>
    %31 = vector.broadcast %30 : vector<4x1xf32> to vector<4x1024xf32>
    %32 = arith.addf %29, %31 : vector<4x1024xf32>
    %c0_25 = arith.constant 0 : index
    %c0_26 = arith.constant 0 : index
    %33 = vector.load %arg8[%c0_25, %c0_26] : memref<4x1024xf32, #tpu.memory_space<vmem>>, vector<4x1024xf32>
    tpu.vector_store %arg8[%c0_25, %c0_26], %32 {strides = array<i32>} : memref<4x1024xf32, #tpu.memory_space<vmem>>, vector<4x1024xf32>,
    return
  }
  func.func @transform_0(%arg0: i32) -> (i32, i32) {
    %c0_i32 = arith.constant 0 : i32
    %c0_i32_0 = arith.constant 0 : i32
    return %arg0, %c0_i32 : i32, i32
  }
  func.func @transform_1(%arg0: i32) -> (i32, i32) {
    %c0_i32 = arith.constant 0 : i32
    %c0_i32_0 = arith.constant 0 : i32
    %c0_i32_1 = arith.constant 0 : i32
    return %c0_i32, %c0_i32_0 : i32, i32
  }
  func.func @transform_2(%arg0: i32) -> (i32, i32) {
    %c0_i32 = arith.constant 0 : i32
    %c0_i32_0 = arith.constant 0 : i32
    %c0_i32_1 = arith.constant 0 : i32
    return %c0_i32, %c0_i32_0 : i32, i32
  }
  func.func @transform_3(%arg0: i32) -> (i32, i32, i32) {
    %c0_i32 = arith.constant 0 : i32
    %c0_i32_0 = arith.constant 0 : i32
    %c0_i32_1 = arith.constant 0 : i32
    %c0_i32_2 = arith.constant 0 : i32
    return %c0_i32, %c0_i32_0, %c0_i32_1 : i32, i32, i32
  }
  func.func @transform_4(%arg0: i32) -> (i32, i32, i32) {
    %c0_i32 = arith.constant 0 : i32
    %c0_i32_0 = arith.constant 0 : i32
    %c0_i32_1 = arith.constant 0 : i32
    %c0_i32_2 = arith.constant 0 : i32
    return %c0_i32, %c0_i32_0, %c0_i32_1 : i32, i32, i32
  }
  func.func @transform_5(%arg0: i32) -> (i32, i32) {
    %c0_i32 = arith.constant 0 : i32
    %c0_i32_0 = arith.constant 0 : i32
    %c0_i32_1 = arith.constant 0 : i32
    return %c0_i32, %c0_i32_0 : i32, i32
  }
  func.func @transform_6(%arg0: i32) -> (i32, i32) {
    %c0_i32 = arith.constant 0 : i32
    %c0_i32_0 = arith.constant 0 : i32
    %c0_i32_1 = arith.constant 0 : i32
    return %c0_i32, %c0_i32_0 : i32, i32
  }
  func.func @transform_7(%arg0: i32) -> (i32, i32) {
    %c0_i32 = arith.constant 0 : i32
    %c0_i32_0 = arith.constant 0 : i32
    return %c0_i32, %arg0 : i32, i32
  }
}

</mosaic_0001>

<bundles_post_ra>
// kernel: tpu_custom_call.1
= control target key start
LH: loop header
LB: loop body
LE: loop exit
PB: predicated region body
PF: predicated region fallthrough
CT: control target
= control target key end

     0   :  { %12 = vsyncpa [#allocation3], 0  ;;  %s3523_s0 = inlined_call_operand.vmem [shape: f32[2048,16], index: 0, kind: input, shape index: {}]   ;;  %s3524_s1 = inlined_call_operand.vmem [shape: bf16[64,16], index: 1, kind: input, shape index: {}]   ;;  %s3525_s2 = inlined_call_operand.vmem [shape: f32[64,1], index: 2, kind: input, shape index: {}]   ;;  %s3526_s3 = inlined_call_operand.vmem [shape: bf16[2,64,64], index: 3, kind: input, shape index: {}]   ;;  %s3527_s4 = inlined_call_operand.vmem [shape: f32[2,64,1], index: 4, kind: input, shape index: {}]   ;;  %s3528_s5 = inlined_call_operand.vmem [shape: bf16[4,64], index: 5, kind: input, shape index: {}]   ;;  %s3529_s6 = inlined_call_operand.vmem [shape: f32[4,1], index: 6, kind: input, shape index: {}]   ;;  %s3530_s7 = inlined_call_operand.hbm [shape: f32[4,2048], index: 7, kind: output, shape index: {}]  }
   0x1   :  { %14 = vsyncpa [#allocation3 + $0x1], 0  ;;  %s2409_s24 = smov 0   ;;  %s2411_s25 = smov 0  }
   0x2   :  { %s2413_s26 = smov 0   ;;  %s2415_s27 = smov 0  }
   0x3 LB: > { %s2430_s28 = sadd.s32 4294967295, %s2366_s27   ;;  %s2068_s29 = sadd.s32 4294967294, %s2366_s27   ;;  %s2366_s27 = sphi %s2415_s27, %s3536_s27   ;;  %s2362_s26 = sphi %s2413_s26, %s3535_s26   ;;  %s2358_s25 = sphi %s2411_s25, %s3534_s25   ;;  %s2354_s24 = sphi %s2409_s24, %s3533_s24  }
   0x4   : > { %s2434_s30 = sadd.s32 1, %s2366_s27   ;;  %s179_s8 = sadd.s32 1, %s2362_s26 }
   0x5   : > { %s176_s9 = ssub.s32 %s2366_s27, %s2434_s30  ;;  %p189_p0 = scmp.ne.s32.totalorder %s2362_s26, %s2358_s25 }
   0x6   : > { %p177_p1 = scmp.eq.s32.totalorder %s176_s9, 0  ;;  %p190_p2 = scmp.eq.s32.totalorder %s2430_s28, 1 }
   0x7   : > { %p195_p3 = scmp.ne.s32.totalorder %s2358_s25, %s2354_s24  ;;  %p196_p4 = scmp.eq.s32.totalorder %s2068_s29, 1 }
   0x8   : > { %s2445_s10 = scalar_select %p177_p1, %s2362_s26, %s179_s8  }
   0x9   : > { %p2447_p5 = por %p190_p2, %p189_p0  ;;  %p2451_p6 = por %p196_p4, %p195_p3 }
   0xa   : > { %p2071_p7 = scmp.ge.s32.totalorder %s2366_s27, 1  ;;  %p241_p8 = scmp.lt.s32.totalorder %s2366_s27, 3 }
   0xc   : > { %p242_p9 = pnand %p2071_p7, %p241_p8 }
   0xd   : > { %s2073_s13 = sshll.u32 (!%p242_p9), %s2430_s28, 7  ;;  %s2260_s16 = sshll.u32 (!%p242_p9), %s2430_s28, 5 }
   0xe   : > { %245 = sbr.rel (%p242_p9) target bundleno = 921 (0x399), region = 48  ;;  %p274_p10 = scmp.lt.s32.totalorder (!%p242_p9), %s2073_s13, 255 }
   0xf   : > { %s2004_s19 = scalar_lea.hbm (!%p242_p9), %s3530_s7, %s2260_s16  ;;  %s2324_s9 = scalar_lea.hbm (!%p242_p9), %s3530_s7, 64 }
  0x10   : > { %s2008_s21 = sshll.u32 (!%p242_p9), %s2004_s19, 4  ;;  %s2009_s21 = int_to_ptr.hbm [resolvable:$true] %s2008_s21 }
  0x11   : > { %s2318_s28 = sshra.s32 (!%p242_p9), %s2009_s21, 4  ;;  %s2319_s28 = int_to_ptr.hbm [resolvable:$true] %s2318_s28 }
  0x12   : > { %s2320_s23 = scalar_lea.hbm (!%p242_p9), %s2319_s28, 32  ;;  %p2325_p0 = scmp.lt.s32.totalorder (!%p242_p9), %s2319_s28, %s3530_s7 }
  0x13   : > { %s3538_s13 = smov (!%p274_p10, %s2073_s13), 255  ;;  %vm549_vm0 = vcmask 130048   ;;  %vm1094_vm1 = vcmask 523264   ;;  %vm1979_vm2 = vcmask 1043456   ;;  %p2321_p11 = scmp.ne.s32.totalorder %s2319_s28, %s2320_s23 }
  0x14   : > { %s2074_s14 = sshll.u32 %s3538_s13, 3  ;;  %s270_s13 = sand.u32 1, %s2358_s25  }
  0x15   : > { %s2461_s17 = scalar_lea.vmem %s3523_s0, %s2074_s14  ;;  %s2072_s14 = sshll.u32 %s270_s13, 5 }
  0x16   : > { %v295_v0 = vld [vmem:[%s2461_s17 + $0x70] sm:$0xff]  ;;  %v296_v1 = vld [vmem:[%s2461_s17 + $0x78] sm:$0xff]  ;;  %v293_v11 = vld [vmem:[%s2461_s17 + $0x60] sm:$0xff]  ;;  %s3480_s15 = scalar_lea.vmem [#allocation2], %s2072_s14  ;;  %s1993_s22 = scalar_lea.sflag [#allocation3], %s270_s13 }
  0x17   : > { %v311_v2 = vld [vmem:[%s2461_s17 + $0xf0] sm:$0xff]  ;;  %v416_v3 = vpack.c.bf16 %v296_v1, %v295_v0  ;;  %v312_v4 = vld [vmem:[%s2461_s17 + $0xf8] sm:$0xff]  ;;  %v294_v14 = vld [vmem:[%s2461_s17 + $0x68] sm:$0xff]  ;;  %s2006_s20 = sshll.u32 %s3480_s15, 4  ;;  %p2322_p12 = pnand %p2321_p11, %p2447_p5  ;;  %s2007_s20 = int_to_ptr.vmem [resolvable:$true] %s2006_s20 }
  0x18   : > { %v327_v5 = vld [vmem:[%s2461_s17 + $0x170] sm:$0xff]  ;;  %v328_v6 = vld [vmem:[%s2461_s17 + $0x178] sm:$0xff]  ;;  %v424_v7 = vpack.c.bf16 %v312_v4, %v311_v2  ;;  %v309_v15 = vld [vmem:[%s2461_s17 + $0xe0] sm:$0xff]  ;;  %v415_v23 = vpack.c.bf16 %v294_v14, %v293_v11  ;;  %p2326_p1 = scmp.lt.s32.totalorder %s2324_s9, %s2320_s23 }
  0x19   : > { %v432_v8 = vpack.c.bf16 %v328_v6, %v327_v5  ;;  %v343_v9 = vld [vmem:[%s2461_s17 + $0x1f0] sm:$0xff]  ;;  %v344_v10 = vld [vmem:[%s2461_s17 + $0x1f8] sm:$0xff]  ;;  %v584_v12 = vsel %vm549_vm0, %v416_v3, 0  ;;  %v310_v16 = vld [vmem:[%s2461_s17 + $0xe8] sm:$0xff]  ;;  %p2323_p13 = pneg %p2322_p12 }
  0x1a   : > { %v440_v13 = vpack.c.bf16 %v344_v10, %v343_v9  ;;  %754 = vmatpush.bf16.xpose.msra.mxu0 %v584_v12  ;;  %v608_v17 = vsel %vm549_vm0, %v424_v7, 0  ;;  %v325_v19 = vld [vmem:[%s2461_s17 + $0x160] sm:$0xff]  ;;  %v326_v20 = vld [vmem:[%s2461_s17 + $0x168] sm:$0xff]  ;;  %v423_v25 = vpack.c.bf16 %v310_v16, %v309_v15  ;;  %v581_v28 = vsel %vm549_vm0, %v415_v23, 0  ;;  %v291_v31 = vld [vmem:[%s2461_s17 + $0x50] sm:$0xff]  ;;  %p2327_p2 = por %p2326_p1, %p2325_p0 }
  0x1b   : > { %v632_v18 = vsel %vm549_vm0, %v432_v8, 0  ;;  %v341_v21 = vld [vmem:[%s2461_s17 + $0x1e0] sm:$0xff]  ;;  %783 = vmatpush.bf16.xpose.msra.mxu1 %v608_v17  ;;  %v342_v24 = vld [vmem:[%s2461_s17 + $0x1e8] sm:$0xff]  ;;  %v431_v26 = vpack.c.bf16 %v326_v20, %v325_v19  ;;  %v292_v32 = vld [vmem:[%s2461_s17 + $0x58] sm:$0xff]  ;;  %v2368_v12 = vmov 0  }
  0x1c   : > { %812 = vmatpush.bf16.xpose.msra.mxu2 %v632_v18  ;;  %v656_v22 = vsel %vm549_vm0, %v440_v13, 0  ;;  %v439_v27 = vpack.c.bf16 %v342_v24, %v341_v21  ;;  %v605_v29 = vsel %vm549_vm0, %v423_v25, 0  ;;  %v307_v33 = vld [vmem:[%s2461_s17 + $0xd0] sm:$0xff]  ;;  %v308_v35 = vld [vmem:[%s2461_s17 + $0xd8] sm:$0xff]  ;;  %v414_v40 = vpack.c.bf16 %v292_v32, %v291_v31  ;;  %v289_v47 = vld [vmem:[%s2461_s17 + $0x40] sm:$0xff]  ;;  %2301 = vset.pattern.permute.xlu0 %v2368_v12  ;;  %p2328_p3 = pnand %p2327_p2, %p2323_p13 }
  0x1d   : > { %841 = vmatpush.bf16.xpose.msra.mxu3 %v656_v22  ;;  %v629_v30 = vsel %vm549_vm0, %v431_v26, 0  ;;  %v323_v36 = vld [vmem:[%s2461_s17 + $0x150] sm:$0xff]  ;;  %v324_v37 = vld [vmem:[%s2461_s17 + $0x158] sm:$0xff]  ;;  %v422_v41 = vpack.c.bf16 %v308_v35, %v307_v33  ;;  %v290_v48 = vld [vmem:[%s2461_s17 + $0x48] sm:$0xff]  ;;  %2302 = vset.pattern.permute.xlu1 %v2368_v12 }
  0x1e   : > { %v653_v34 = vsel %vm549_vm0, %v439_v27, 0  ;;  %v339_v38 = vld [vmem:[%s2461_s17 + $0x1d0] sm:$0xff]  ;;  %v340_v39 = vld [vmem:[%s2461_s17 + $0x1d8] sm:$0xff]  ;;  %v430_v42 = vpack.c.bf16 %v324_v37, %v323_v36  ;;  %v578_v44 = vsel %vm549_vm0, %v414_v40, 0  ;;  %v305_v49 = vld [vmem:[%s2461_s17 + $0xc0] sm:$0xff]  ;;  %v413_v56 = vpack.c.bf16 %v290_v48, %v289_v47  ;;  %2303 = vset.pattern.permute.xlu2 %v2368_v12 }
  0x1f   : > { %v438_v43 = vpack.c.bf16 %v340_v39, %v339_v38  ;;  %v602_v45 = vsel %vm549_vm0, %v422_v41, 0  ;;  %v306_v51 = vld [vmem:[%s2461_s17 + $0xc8] sm:$0xff]  ;;  %v321_v52 = vld [vmem:[%s2461_s17 + $0x140] sm:$0xff]  ;;  %v287_v63 = vld [vmem:[%s2461_s17 + $0x30] sm:$0xff] }
  0x20   : > { %v626_v46 = vsel %vm549_vm0, %v430_v42, 0  ;;  %v322_v53 = vld [vmem:[%s2461_s17 + $0x148] sm:$0xff]  ;;  %v337_v54 = vld [vmem:[%s2461_s17 + $0x1c0] sm:$0xff]  ;;  %v421_v57 = vpack.c.bf16 %v306_v51, %v305_v49  ;;  %v575_v60 = vsel %vm549_vm0, %v413_v56, 0  ;;  %v288_v0 = vld [vmem:[%s2461_s17 + $0x38] sm:$0xff] }
  0x21   : > { %v650_v50 = vsel %vm549_vm0, %v438_v43, 0  ;;  %v338_v55 = vld [vmem:[%s2461_s17 + $0x1c8] sm:$0xff]  ;;  %v429_v58 = vpack.c.bf16 %v322_v53, %v321_v52  ;;  %v303_v1 = vld [vmem:[%s2461_s17 + $0xb0] sm:$0xff]  ;;  %v304_v3 = vld [vmem:[%s2461_s17 + $0xb8] sm:$0xff]  ;;  %v412_v8 = vpack.c.bf16 %v288_v0, %v287_v63 }
  0x22   : > { %755 = vmatpush.bf16.xpose.msra.mxu0 %v581_v28  ;;  %v437_v59 = vpack.c.bf16 %v338_v55, %v337_v54  ;;  %v599_v61 = vsel %vm549_vm0, %v421_v57, 0  ;;  %v319_v4 = vld [vmem:[%s2461_s17 + $0x130] sm:$0xff]  ;;  %v320_v5 = vld [vmem:[%s2461_s17 + $0x138] sm:$0xff]  ;;  %v420_v9 = vpack.c.bf16 %v304_v3, %v303_v1  ;;  %v285_v16 = vld [vmem:[%s2461_s17 + $0x20] sm:$0xff] }
  0x23   : > { %784 = vmatpush.bf16.xpose.msra.mxu1 %v605_v29  ;;  %v623_v62 = vsel %vm549_vm0, %v429_v58, 0  ;;  %v335_v6 = vld [vmem:[%s2461_s17 + $0x1b0] sm:$0xff]  ;;  %v336_v7 = vld [vmem:[%s2461_s17 + $0x1b8] sm:$0xff]  ;;  %v428_v10 = vpack.c.bf16 %v320_v5, %v319_v4  ;;  %v572_v13 = vsel %vm549_vm0, %v412_v8, 0  ;;  %v286_v17 = vld [vmem:[%s2461_s17 + $0x28] sm:$0xff] }
  0x24   : > { %813 = vmatpush.bf16.xpose.msra.mxu2 %v629_v30  ;;  %v647_v2 = vsel %vm549_vm0, %v437_v59, 0  ;;  %v436_v11 = vpack.c.bf16 %v336_v7, %v335_v6  ;;  %v596_v14 = vsel %vm549_vm0, %v420_v9, 0  ;;  %v301_v18 = vld [vmem:[%s2461_s17 + $0xa0] sm:$0xff]  ;;  %v302_v20 = vld [vmem:[%s2461_s17 + $0xa8] sm:$0xff]  ;;  %v411_v25 = vpack.c.bf16 %v286_v17, %v285_v16  ;;  %v487_v26 = vld [vmem:[%s3525_s2 + $0x30] sm:$0xff] }
  0x25   : > { %842 = vmatpush.bf16.xpose.msra.mxu3 %v653_v34  ;;  %v620_v15 = vsel %vm549_vm0, %v428_v10, 0  ;;  %v317_v21 = vld [vmem:[%s2461_s17 + $0x120] sm:$0xff]  ;;  %v318_v22 = vld [vmem:[%s2461_s17 + $0x128] sm:$0xff]  ;;  %v419_v28 = vpack.c.bf16 %v302_v20, %v301_v18  ;;  %521 = vperm.xlu0 %2301, %v487_v26   ;;  %v283_v32 = vld [vmem:[%s2461_s17 + $0x10] sm:$0xff] }
  0x26   : > { %v644_v19 = vsel %vm549_vm0, %v436_v11, 0  ;;  %v333_v23 = vld [vmem:[%s2461_s17 + $0x1a0] sm:$0xff]  ;;  %v334_v24 = vld [vmem:[%s2461_s17 + $0x1a8] sm:$0xff]  ;;  %v427_v29 = vpack.c.bf16 %v318_v22, %v317_v21  ;;  %v569_v31 = vsel %vm549_vm0, %v411_v25, 0  ;;  %v284_v35 = vld [vmem:[%s2461_s17 + $0x18] sm:$0xff] }
  0x27   : > { %v485_v27 = vld [vmem:[%s3525_s2 + $0x20] sm:$0xff]  ;;  %v435_v30 = vpack.c.bf16 %v334_v24, %v333_v23  ;;  %v593_v33 = vsel %vm549_vm0, %v419_v28, 0  ;;  %v299_v36 = vld [vmem:[%s2461_s17 + $0x90] sm:$0xff]  ;;  %v300_v37 = vld [vmem:[%s2461_s17 + $0x98] sm:$0xff] }
  0x28   : > { %511 = vperm.xlu1 %2302, %v485_v27   ;;  %v617_v34 = vsel %vm549_vm0, %v427_v29, 0  ;;  %v315_v39 = vld [vmem:[%s2461_s17 + $0x110] sm:$0xff]  ;;  %v316_v40 = vld [vmem:[%s2461_s17 + $0x118] sm:$0xff]  ;;  %v281_v48 = vld [vmem:[%s2461_s17] sm:$0xff] }
  0x29   : > { %v641_v38 = vsel %vm549_vm0, %v435_v30, 0  ;;  %v488_v41 = vld [vmem:[%s3525_s2 + $0x38] sm:$0xff]  ;;  %v331_v42 = vld [vmem:[%s2461_s17 + $0x190] sm:$0xff]  ;;  %v297_v51 = vld [vmem:[%s2461_s17 + $0x80] sm:$0xff] }
  0x2a   : > { %756 = vmatpush.bf16.xpose.msra.mxu0 %v578_v44  ;;  %v332_v43 = vld [vmem:[%s2461_s17 + $0x198] sm:$0xff]  ;;  %v410_v44 = vpack.c.bf16 %v284_v35, %v283_v32  ;;  %v298_v52 = vld [vmem:[%s2461_s17 + $0x88] sm:$0xff]  ;;  %v313_v55 = vld [vmem:[%s2461_s17 + $0x100] sm:$0xff] }
  0x2b   : > { %785 = vmatpush.bf16.xpose.msra.mxu1 %v602_v45  ;;  %v418_v45 = vpack.c.bf16 %v300_v37, %v299_v36  ;;  %v434_v47 = vpack.c.bf16 %v332_v43, %v331_v42  ;;  %v314_v56 = vld [vmem:[%s2461_s17 + $0x108] sm:$0xff]  ;;  %v329_v57 = vld [vmem:[%s2461_s17 + $0x180] sm:$0xff]  ;;  %v376_v63 = vld [vmem:[%s2461_s17 + $0x2f8] sm:$0xff]  ;;  %v417_v5 = vpack.c.bf16 %v298_v52, %v297_v51 }
  0x2c   : > { %814 = vmatpush.bf16.xpose.msra.mxu2 %v626_v46  ;;  %v426_v46 = vpack.c.bf16 %v316_v40, %v315_v39  ;;  %v566_v49 = vsel %vm549_vm0, %v410_v44, 0  ;;  %v330_v59 = vld [vmem:[%s2461_s17 + $0x188] sm:$0xff]  ;;  %v391_v0 = vld [vmem:[%s2461_s17 + $0x370] sm:$0xff]  ;;  %v481_v4 = vld [vmem:[%s3525_s2] sm:$0xff]  ;;  %v425_v6 = vpack.c.bf16 %v314_v56, %v313_v55 }
  0x2d   : > { %843 = vmatpush.bf16.xpose.msra.mxu3 %v650_v50  ;;  %526 = vperm.xlu0 %2301, %v488_v41   ;;  %v282_v50 = vld [vmem:[%s2461_s17 + $0x8] sm:$0xff]  ;;  %v590_v53 = vsel %vm549_vm0, %v418_v45, 0  ;;  %v638_v58 = vsel %vm549_vm0, %v434_v47, 0  ;;  %v407_v7 = vld [vmem:[%s2461_s17 + $0x3f0] sm:$0xff]  ;;  %v408_v8 = vld [vmem:[%s2461_s17 + $0x3f8] sm:$0xff]  ;;  %v433_v9 = vpack.c.bf16 %v330_v59, %v329_v57 }
  0x2e   : > { %v614_v54 = vsel %vm549_vm0, %v426_v46, 0  ;;  %v409_v1 = vpack.c.bf16 %v282_v50, %v281_v48  ;;  %v486_v3 = vld [vmem:[%s3525_s2 + $0x28] sm:$0xff]  ;;  %v611_v16 = vsel %vm549_vm0, %v425_v6, 0  ;;  %v373_v23 = vld [vmem:[%s2461_s17 + $0x2e0] sm:$0xff]  ;;  %v356_v39 = vld [vmem:[%s2461_s17 + $0x258] sm:$0xff] }
  0x2f   : > { %v635_v17 = vsel %vm549_vm0, %v433_v9, 0  ;;  %v358_v22 = vld [vmem:[%s2461_s17 + $0x268] sm:$0xff]  ;;  %v389_v26 = vld [vmem:[%s2461_s17 + $0x360] sm:$0xff]  ;;  %v371_v42 = vld [vmem:[%s2461_s17 + $0x2d0] sm:$0xff] }
  0x30   : > { %516 = vperm.xlu1 %2302, %v486_v3   ;;  %v374_v24 = vld [vmem:[%s2461_s17 + $0x2e8] sm:$0xff]  ;;  %v405_v29 = vld [vmem:[%s2461_s17 + $0x3e0] sm:$0xff]  ;;  %v372_v43 = vld [vmem:[%s2461_s17 + $0x2d8] sm:$0xff] }
  0x31   : > { %v390_v27 = vld [vmem:[%s2461_s17 + $0x368] sm:$0xff]  ;;  %v2603_v32 = vld [vmem:[%s3524_s1] sm:$0xff]  ;;  %v387_v44 = vld [vmem:[%s2461_s17 + $0x350] sm:$0xff] }
  0x32   : > { %757 = vmatpush.bf16.xpose.msra.mxu0 %v575_v60  ;;  %v359_v60 = vld [vmem:[%s2461_s17 + $0x270] sm:$0xff]  ;;  %v482_v28 = vld [vmem:[%s3525_s2 + $0x8] sm:$0xff]  ;;  %v463_v35 = vpack.c.bf16 %v390_v27, %v389_v26  ;;  %v388_v46 = vld [vmem:[%s2461_s17 + $0x358] sm:$0xff] }
  0x33   : > { %786 = vmatpush.bf16.xpose.msra.mxu1 %v599_v61  ;;  %v360_v61 = vld [vmem:[%s2461_s17 + $0x278] sm:$0xff]  ;;  %v406_v30 = vld [vmem:[%s2461_s17 + $0x3e8] sm:$0xff]  ;;  %v1030_v47 = vld [vmem:[%s3527_s4 + $0x20] sm:$0xff] }
  0x34   : > { %815 = vmatpush.bf16.xpose.msra.mxu2 %v623_v62  ;;  %v375_v62 = vld [vmem:[%s2461_s17 + $0x2f0] sm:$0xff]  ;;  %v448_v10 = vpack.c.bf16 %v360_v61, %v359_v60  ;;  %v471_v36 = vpack.c.bf16 %v406_v30, %v405_v29  ;;  %v725_v41 = vsel %vm549_vm0, %v463_v35, 0  ;;  %v404_v50 = vld [vmem:[%s2461_s17 + $0x3d8] sm:$0xff]  ;;  %v353_v57 = vld [vmem:[%s2461_s17 + $0x240] sm:$0xff] }
  0x35   : > { %844 = vmatpush.bf16.xpose.msra.mxu3 %v647_v2  ;;  %v392_v2 = vld [vmem:[%s2461_s17 + $0x378] sm:$0xff]  ;;  %491 = vperm.xlu0 %2301, %v481_v4   ;;  %v456_v11 = vpack.c.bf16 %v376_v63, %v375_v62  ;;  %v483_v48 = vld [vmem:[%s3525_s2 + $0x10] sm:$0xff]  ;;  %v354_v60 = vld [vmem:[%s2461_s17 + $0x248] sm:$0xff] }
  0x36   : > { %v464_v12 = vpack.c.bf16 %v392_v2, %v391_v0  ;;  %v680_v18 = vsel %vm549_vm0, %v448_v10, 0  ;;  %v749_v45 = vsel %vm549_vm0, %v471_v36, 0  ;;  %v1028_v51 = vld [vmem:[%s3527_s4 + $0x10] sm:$0xff]  ;;  %501 = vperm.xlu2 %2303, %v483_v48   ;;  %v369_v61 = vld [vmem:[%s2461_s17 + $0x2c0] sm:$0xff]  ;;  %v370_v62 = vld [vmem:[%s2461_s17 + $0x2c8] sm:$0xff] }
  0x37   : > { %v704_v20 = vsel %vm549_vm0, %v456_v11, 0  ;;  %v385_v0 = vld [vmem:[%s2461_s17 + $0x340] sm:$0xff]  ;;  %v1029_v2 = vld [vmem:[%s3527_s4 + $0x18] sm:$0xff]  ;;  %v402_v4 = vld [vmem:[%s2461_s17 + $0x3c8] sm:$0xff] }
  0x38   : > { %v728_v21 = vsel %vm549_vm0, %v464_v12, 0  ;;  %496 = vperm.xlu1 %2302, %v482_v28   ;;  %v401_v3 = vld [vmem:[%s2461_s17 + $0x3c0] sm:$0xff]  ;;  %v2655_v6 = vld [vmem:[%s3524_s1 + $0x8] sm:$0xff]  ;;  %v351_v12 = vld [vmem:[%s2461_s17 + $0x230] sm:$0xff] }
  0x39   : > { %v469_v10 = vpack.c.bf16 %v402_v4, %v401_v3  ;;  %v350_v36 = vld [vmem:[%s2461_s17 + $0x228] sm:$0xff] }
  0x3a   : > { %758 = vmatpush.bf16.xpose.msra.mxu0 %v572_v13  ;;  %v563_v13 = vsel %vm549_vm0, %v409_v1, 0  ;;  %v386_v1 = vld [vmem:[%s2461_s17 + $0x348] sm:$0xff] }
  0x3b   : > { %787 = vmatpush.bf16.xpose.msra.mxu1 %v596_v14  ;;  %v472_v14 = vpack.c.bf16 %v408_v8, %v407_v7  ;;  %v445_v7 = vpack.c.bf16 %v354_v60, %v353_v57  ;;  %v453_v8 = vpack.c.bf16 %v370_v62, %v369_v61  ;;  %v461_v9 = vpack.c.bf16 %v386_v1, %v385_v0  ;;  %v364_v57 = vld [vmem:[%s2461_s17 + $0x298] sm:$0xff]  ;;  %v1031_v61 = vld [vmem:[%s3527_s4 + $0x28] sm:$0xff]  ;;  %v2179_v62 = vld [vmem:[%s3527_s4 + $0x40] sm:$0xff] }
  0x3c   : > { %816 = vmatpush.bf16.xpose.msra.mxu2 %v620_v15  ;;  %v587_v15 = vsel %vm549_vm0, %v417_v5, 0  ;;  %v1027_v5 = vld [vmem:[%s3527_s4 + $0x8] sm:$0xff]  ;;  %v380_v60 = vld [vmem:[%s2461_s17 + $0x318] sm:$0xff]  ;;  %v1854_v1 = vld [vmem:[%s3529_s6] sm:$0xf] }
  0x3d   : > { %845 = vmatpush.bf16.xpose.msra.mxu3 %v644_v19  ;;  %v357_v19 = vld [vmem:[%s2461_s17 + $0x260] sm:$0xff]  ;;  %v752_v25 = vsel %vm549_vm0, %v472_v14, 0  ;;  %v671_v11 = vsel %vm549_vm0, %v445_v7, 0  ;;  %v695_v14 = vsel %vm549_vm0, %v453_v8, 0  ;;  %v396_v0 = vld [vmem:[%s2461_s17 + $0x398] sm:$0xff] }
  0x3e   : > { %v1026_v8 = vld [vmem:[%s3527_s4] sm:$0xff] }
  0x40   : > { %1056 = vperm.xlu1 %2302, %v1030_v47  }
  0x42   : > { %759 = vmatpush.bf16.xpose.msra.mxu0 %v569_v31  ;;  %v1033_v31 = vld [vmem:[%s3527_s4 + $0x38] sm:$0xff] }
  0x43   : > { %788 = vmatpush.bf16.xpose.msra.mxu1 %v593_v33  ;;  %v447_v33 = vpack.c.bf16 %v358_v22, %v357_v19  ;;  %1071 = vperm.xlu0 %2301, %v1033_v31   ;;  %v743_v19 = vsel %vm549_vm0, %v469_v10, 0  ;;  %v2185_v22 = vld [vmem:[%s3527_s4 + $0x70] sm:$0xff]  ;;  %v349_v31 = vld [vmem:[%s2461_s17 + $0x220] sm:$0xff] }
  0x44   : > { %817 = vmatpush.bf16.xpose.msra.mxu2 %v617_v34  ;;  %v455_v34 = vpack.c.bf16 %v374_v24, %v373_v23  ;;  %v399_v23 = vld [vmem:[%s2461_s17 + $0x3b0] sm:$0xff]  ;;  %v400_v24 = vld [vmem:[%s2461_s17 + $0x3b8] sm:$0xff]  ;;  %v443_v47 = vpack.c.bf16 %v350_v36, %v349_v31  ;;  %v2180_v31 = vld [vmem:[%s3527_s4 + $0x48] sm:$0xff] }
  0x45   : > { %846 = vmatpush.bf16.xpose.msra.mxu3 %v641_v38  ;;  %v677_v37 = vsel %vm549_vm0, %v447_v33, 0  ;;  %v355_v38 = vld [vmem:[%s2461_s17 + $0x250] sm:$0xff]  ;;  %v468_v29 = vpack.c.bf16 %v400_v24, %v399_v23 }
  0x46   : > { %v701_v40 = vsel %vm549_vm0, %v455_v34, 0  ;;  %v446_v52 = vpack.c.bf16 %v356_v39, %v355_v38  ;;  %v1032_v33 = vld [vmem:[%s3527_s4 + $0x30] sm:$0xff]  ;;  %v366_v38 = vld [vmem:[%s2461_s17 + $0x2a8] sm:$0xff] }
  0x47   : > { %v740_v39 = vsel %vm549_vm0, %v468_v29, 0  ;;  %v2186_v29 = vld [vmem:[%s3527_s4 + $0x78] sm:$0xff] }
  0x48   : > { %v674_v56 = vsel %vm549_vm0, %v446_v52, 0  ;;  %1051 = vperm.xlu1 %2302, %v1029_v2   ;;  %v347_v52 = vld [vmem:[%s2461_s17 + $0x210] sm:$0xff] }
  0x4a   : > { %760 = vmatpush.bf16.xpose.msra.mxu0 %v566_v49  ;;  %v403_v49 = vld [vmem:[%s2461_s17 + $0x3d0] sm:$0xff] }
  0x4b   : > { %789 = vmatpush.bf16.xpose.msra.mxu1 %v590_v53  ;;  %v454_v53 = vpack.c.bf16 %v372_v43, %v371_v42  ;;  %v470_v55 = vpack.c.bf16 %v404_v50, %v403_v49  ;;  %1046 = vperm.xlu0 %2301, %v1028_v51   ;;  %v2184_v42 = vld [vmem:[%s3527_s4 + $0x68] sm:$0xff]  ;;  %v397_v43 = vld [vmem:[%s2461_s17 + $0x3a0] sm:$0xff]  ;;  %v665_v51 = vsel %vm549_vm0, %v443_v47, 0 }
  0x4c   : > { %818 = vmatpush.bf16.xpose.msra.mxu2 %v614_v54  ;;  %v462_v54 = vpack.c.bf16 %v388_v46, %v387_v44  ;;  %v398_v44 = vld [vmem:[%s2461_s17 + $0x3a8] sm:$0xff]  ;;  %v2710_v46 = vld [vmem:[%s3524_s1 + $0x10] sm:$0xff] }
  0x4d   : > { %847 = vmatpush.bf16.xpose.msra.mxu3 %v638_v58  ;;  %v698_v58 = vsel %vm549_vm0, %v454_v53, 0  ;;  %v746_v63 = vsel %vm549_vm0, %v470_v55, 0  ;;  %v467_v50 = vpack.c.bf16 %v398_v44, %v397_v43  ;;  %v348_v53 = vld [vmem:[%s2461_s17 + $0x218] sm:$0xff] }
  0x4e   : > { %v722_v59 = vsel %vm549_vm0, %v462_v54, 0  ;;  %v442_v2 = vpack.c.bf16 %v348_v53, %v347_v52 }
  0x50   : > { %1485 = vperm.xlu1 %2302, %v2185_v22   ;;  %v662_v7 = vsel %vm549_vm0, %v442_v2, 0 }
  0x52   : > { %761 = vmatpush.bf16.xpose.msra.mxu0 %v563_v13  ;;  %v352_v13 = vld [vmem:[%s2461_s17 + $0x238] sm:$0xff] }
  0x53   : > { %790 = vmatpush.bf16.xpose.msra.mxu1 %v587_v15  ;;  %1041 = vperm.xlu0 %2301, %v1027_v5   ;;  %v719_v15 = vsel %vm549_vm0, %v461_v9, 0  ;;  %v444_v26 = vpack.c.bf16 %v352_v13, %v351_v12  ;;  %v346_v12 = vld [vmem:[%s2461_s17 + $0x208] sm:$0xff]  ;;  %v361_v13 = vld [vmem:[%s2461_s17 + $0x280] sm:$0xff] }
  0x54   : > { %819 = vmatpush.bf16.xpose.msra.mxu2 %v611_v16  ;;  %v367_v16 = vld [vmem:[%s2461_s17 + $0x2b0] sm:$0xff] }
  0x55   : > { %848 = vmatpush.bf16.xpose.msra.mxu3 %v635_v17  ;;  %v368_v17 = vld [vmem:[%s2461_s17 + $0x2b8] sm:$0xff]  ;;  %v668_v30 = vsel %vm549_vm0, %v444_v26, 0 }
  0x56   : > { %v452_v27 = vpack.c.bf16 %v368_v17, %v367_v16  ;;  %v377_v16 = vld [vmem:[%s2461_s17 + $0x300] sm:$0xff]  ;;  %v378_v17 = vld [vmem:[%s2461_s17 + $0x308] sm:$0xff] }
  0x57   : > { %v457_v23 = vpack.c.bf16 %v378_v17, %v377_v16 }
  0x58   : > { %v692_v34 = vsel %vm549_vm0, %v452_v27, 0  ;;  %1480 = vperm.xlu1 %2302, %v2184_v42  }
  0x59   : > { %2091 = vmatmul.msk.bf16.vlgmr.msra.gmra.mxu0 %vm549_vm0, %v2603_v32  ;;  %v707_v27 = vsel %vm549_vm0, %v457_v23, 0 }
  0x5a   : > { %870 = vmatpush.bf16.xpose.msrb.mxu0 %v680_v18  ;;  %2095 = vmatmul.msk.bf16.vlgmr.msra.gmra.mxu1 %vm549_vm0, %v2603_v32  ;;  %v383_v18 = vld [vmem:[%s2461_s17 + $0x330] sm:$0xff] }
  0x5b   : > { %899 = vmatpush.bf16.xpose.msrb.mxu1 %v704_v20  ;;  %2099 = vmatmul.msk.bf16.vlgmr.msra.gmra.mxu2 %vm549_vm0, %v2603_v32  ;;  %v384_v20 = vld [vmem:[%s2461_s17 + $0x338] sm:$0xff] }
  0x5c   : > { %928 = vmatpush.bf16.xpose.msrb.mxu2 %v728_v21  ;;  %2103 = vmatmul.msk.bf16.vlgmr.msra.gmra.mxu3 %vm549_vm0, %v2603_v32  ;;  %v484_v21 = vld [vmem:[%s3525_s2 + $0x18] sm:$0xff]  ;;  %v460_v28 = vpack.c.bf16 %v384_v20, %v383_v18  ;;  %v393_v18 = vld [vmem:[%s2461_s17 + $0x380] sm:$0xff] }
  0x5d   : > { %957 = vmatpush.bf16.xpose.msrb.mxu3 %v752_v25  ;;  %506 = vperm.xlu2 %2303, %v484_v21   ;;  %v2183_v25 = vld [vmem:[%s3527_s4 + $0x60] sm:$0xff]  ;;  %v2251_v20 = vld [vmem:[%s3524_s1 + $0x18] sm:$0xff] }
  0x5e   : > { %1475 = vperm.xlu0 %2301, %v2183_v25   ;;  %v716_v35 = vsel %vm549_vm0, %v460_v28, 0 }
  0x60   : > { %1455 = vperm.xlu1 %2302, %v2179_v62  }
  0x62   : > { %871 = vmatpush.bf16.xpose.msrb.mxu0 %v677_v37  ;;  %v365_v37 = vld [vmem:[%s2461_s17 + $0x2a0] sm:$0xff] }
  0x63   : > { %900 = vmatpush.bf16.xpose.msrb.mxu1 %v701_v40  ;;  %v381_v40 = vld [vmem:[%s2461_s17 + $0x320] sm:$0xff]  ;;  %v451_v48 = vpack.c.bf16 %v366_v38, %v365_v37 }
  0x64   : > { %929 = vmatpush.bf16.xpose.msrb.mxu2 %v725_v41  ;;  %v382_v41 = vld [vmem:[%s2461_s17 + $0x328] sm:$0xff] }
  0x65   : > { %958 = vmatpush.bf16.xpose.msrb.mxu3 %v749_v45  ;;  %1066 = vperm.xlu2 %2303, %v1032_v33   ;;  %v2182_v45 = vld [vmem:[%s3527_s4 + $0x58] sm:$0xff]  ;;  %v459_v49 = vpack.c.bf16 %v382_v41, %v381_v40  ;;  %v689_v54 = vsel %vm549_vm0, %v451_v48, 0 }
  0x66   : > { %1470 = vperm.xlu0 %2301, %v2182_v45  }
  0x67   : > { %v713_v55 = vsel %vm549_vm0, %v459_v49, 0 }
  0x69   : > { %2092 = vmatmul.msk.bf16.gmra.mxu0 %vm549_vm0, %v2655_v6 }
  0x6a   : > { %872 = vmatpush.bf16.xpose.msrb.mxu0 %v674_v56  ;;  %2096 = vmatmul.msk.bf16.gmra.mxu1 %vm549_vm0, %v2655_v6  ;;  %v363_v56 = vld [vmem:[%s2461_s17 + $0x290] sm:$0xff] }
  0x6b   : > { %901 = vmatpush.bf16.xpose.msrb.mxu1 %v698_v58  ;;  %2100 = vmatmul.msk.bf16.gmra.mxu2 %vm549_vm0, %v2655_v6  ;;  %v379_v58 = vld [vmem:[%s2461_s17 + $0x310] sm:$0xff]  ;;  %v450_v3 = vpack.c.bf16 %v364_v57, %v363_v56 }
  0x6c   : > { %930 = vmatpush.bf16.xpose.msrb.mxu2 %v722_v59  ;;  %2104 = vmatmul.msk.bf16.gmra.mxu3 %vm549_vm0, %v2655_v6  ;;  %v737_v59 = vsel %vm549_vm0, %v467_v50, 0  ;;  %v458_v4 = vpack.c.bf16 %v380_v60, %v379_v58 }
  0x6d   : > { %959 = vmatpush.bf16.xpose.msrb.mxu3 %v746_v63  ;;  %v395_v63 = vld [vmem:[%s2461_s17 + $0x390] sm:$0xff]  ;;  %1061 = vperm.xlu2 %2303, %v1031_v61   ;;  %v686_v9 = vsel %vm549_vm0, %v450_v3, 0 }
  0x6e   : > { %v466_v5 = vpack.c.bf16 %v396_v0, %v395_v63  ;;  %1857 = vperm.xlu0 %2301, %v1854_v1   ;;  %v710_v10 = vsel %vm549_vm0, %v458_v4, 0 }
  0x72   : > { %873 = vmatpush.bf16.xpose.msrb.mxu0 %v671_v11  ;;  %v345_v11 = vld [vmem:[%s2461_s17 + $0x200] sm:$0xff] }
  0x73   : > { %902 = vmatpush.bf16.xpose.msrb.mxu1 %v695_v14  ;;  %v734_v14 = vsel %vm549_vm0, %v466_v5, 0  ;;  %v441_v21 = vpack.c.bf16 %v346_v12, %v345_v11 }
  0x74   : > { %931 = vmatpush.bf16.xpose.msrb.mxu2 %v719_v15  ;;  %v362_v15 = vld [vmem:[%s2461_s17 + $0x288] sm:$0xff] }
  0x75   : > { %960 = vmatpush.bf16.xpose.msrb.mxu3 %v743_v19  ;;  %v394_v19 = vld [vmem:[%s2461_s17 + $0x388] sm:$0xff]  ;;  %1036 = vperm.xlu2 %2303, %v1026_v8   ;;  %v449_v22 = vpack.c.bf16 %v362_v15, %v361_v13  ;;  %v659_v25 = vsel %vm549_vm0, %v441_v21, 0 }
  0x76   : > { %v465_v24 = vpack.c.bf16 %v394_v19, %v393_v18 }
  0x77   : > { %v683_v26 = vsel %vm549_vm0, %v449_v22, 0 }
  0x78   : > { %v731_v28 = vsel %vm549_vm0, %v465_v24, 0 }
  0x79   : > { %2093 = vmatmul.msk.bf16.gmra.mxu0 %vm549_vm0, %v2710_v46 }
  0x7a   : > { %874 = vmatpush.bf16.xpose.msrb.mxu0 %v668_v30  ;;  %2097 = vmatmul.msk.bf16.gmra.mxu1 %vm549_vm0, %v2710_v46  ;;  %v2181_v30 = vld [vmem:[%s3527_s4 + $0x50] sm:$0xff] }
  0x7b   : > { %903 = vmatpush.bf16.xpose.msrb.mxu1 %v692_v34  ;;  %2101 = vmatmul.msk.bf16.gmra.mxu2 %vm549_vm0, %v2710_v46 }
  0x7c   : > { %932 = vmatpush.bf16.xpose.msrb.mxu2 %v716_v35  ;;  %2105 = vmatmul.msk.bf16.gmra.mxu3 %vm549_vm0, %v2710_v46 }
  0x7d   : > { %961 = vmatpush.bf16.xpose.msrb.mxu3 %v740_v39  ;;  %1490 = vperm.xlu2 %2303, %v2186_v29  }
  0x82   : > { %875 = vmatpush.bf16.xpose.msrb.mxu0 %v665_v51 }
  0x83   : > { %904 = vmatpush.bf16.xpose.msrb.mxu1 %v689_v54 }
  0x84   : > { %933 = vmatpush.bf16.xpose.msrb.mxu2 %v713_v55 }
  0x85   : > { %962 = vmatpush.bf16.xpose.msrb.mxu3 %v737_v59  ;;  %1465 = vperm.xlu2 %2303, %v2181_v30  }
  0x89   : > { %2094 = vmatmul.msk.bf16.gmra.mxu0 %vm549_vm0, %v2251_v20 }
  0x8a   : > { %876 = vmatpush.bf16.xpose.msrb.mxu0 %v662_v7  ;;  %2098 = vmatmul.msk.bf16.gmra.mxu1 %vm549_vm0, %v2251_v20 }
  0x8b   : > { %905 = vmatpush.bf16.xpose.msrb.mxu1 %v686_v9  ;;  %2102 = vmatmul.msk.bf16.gmra.mxu2 %vm549_vm0, %v2251_v20 }
  0x8c   : > { %934 = vmatpush.bf16.xpose.msrb.mxu2 %v710_v10  ;;  %2106 = vmatmul.msk.bf16.gmra.mxu3 %vm549_vm0, %v2251_v20 }
  0x8d   : > { %963 = vmatpush.bf16.xpose.msrb.mxu3 %v734_v14  ;;  %1460 = vperm.xlu2 %2303, %v2180_v31  }
  0x90   : > { %v2832_v59 = vpop.permute.xlu2 %501 }
  0x92   : > { %877 = vmatpush.bf16.xpose.msrb.mxu0 %v659_v25 }
  0x93   : > { %906 = vmatpush.bf16.xpose.msrb.mxu1 %v683_v26 }
  0x94   : > { %935 = vmatpush.bf16.xpose.msrb.mxu2 %v707_v27 }
  0x95   : > { %964 = vmatpush.bf16.xpose.msrb.mxu3 %v731_v28 }
  0x97   : > { %v2828_v53 = vpop.permute.xlu0 %521 }
  0x99   : > { %2107 = vmatmul.msk.bf16.vlgmr.msrb.gmra.mxu0 %vm549_vm0, %v2603_v32 }
  0x9a   : > { %2111 = vmatmul.msk.bf16.vlgmr.msrb.gmra.mxu1 %vm549_vm0, %v2603_v32  ;;  %v2830_v54 = vpop.permute.xlu1 %511 }
  0x9b   : > { %2115 = vmatmul.msk.bf16.vlgmr.msrb.gmra.mxu2 %vm549_vm0, %v2603_v32 }
  0x9c   : > { %2119 = vmatmul.msk.bf16.vlgmr.msrb.gmra.mxu3 %vm549_vm0, %v2603_v32 }
  0x9f   : > { %v2834_v60 = vpop.permute.xlu0 %526 }
  0xa2   : > { %v2836_v61 = vpop.permute.xlu1 %516 }
  0xa7   : > { %v2856_v25 = vpop.permute.xlu0 %491 }
  0xa9   : > { %2108 = vmatmul.msk.bf16.gmra.mxu0 %vm549_vm0, %v2655_v6 }
  0xaa   : > { %2112 = vmatmul.msk.bf16.gmra.mxu1 %vm549_vm0, %v2655_v6  ;;  %v2862_v29 = vpop.permute.xlu1 %496 }
  0xab   : > { %2116 = vmatmul.msk.bf16.gmra.mxu2 %vm549_vm0, %v2655_v6 }
  0xac   : > { %2120 = vmatmul.msk.bf16.gmra.mxu3 %vm549_vm0, %v2655_v6 }
  0xb7   : > { %v2846_v13 = vpop.permute.xlu2 %506 }
  0xb9   : > { %2109 = vmatmul.msk.bf16.gmra.mxu0 %vm549_vm0, %v2710_v46 }
  0xba   : > { %2113 = vmatmul.msk.bf16.gmra.mxu1 %vm549_vm0, %v2710_v46 }
  0xbb   : > { %2117 = vmatmul.msk.bf16.gmra.mxu2 %vm549_vm0, %v2710_v46 }
  0xbc   : > { %2121 = vmatmul.msk.bf16.gmra.mxu3 %vm549_vm0, %v2710_v46 }
  0xc9   : > { %2110 = vmatmul.msk.bf16.gmra.mxu0 %vm549_vm0, %v2251_v20 }
  0xca   : > { %2114 = vmatmul.msk.bf16.gmra.mxu1 %vm549_vm0, %v2251_v20 }
  0xcb   : > { %2118 = vmatmul.msk.bf16.gmra.mxu2 %vm549_vm0, %v2251_v20 }
  0xcc   : > { %2122 = vmatmul.msk.bf16.gmra.mxu3 %vm549_vm0, %v2251_v20 }
  0xd6   : > { %v2804_v32 = vpop.f32.mrf.mxu0 }
  0xd7   : > { %v2806_v6 = vpop.f32.mrf.mxu1 }
  0xde   : > { %v2808_v33 = vpop.f32.mrf.mxu2  ;;  %v2812_v35 = vpop.f32.mrf.mxu0 }
  0xdf   : > { %v2810_v34 = vpop.f32.mrf.mxu3  ;;  %v2814_v36 = vpop.f32.mrf.mxu1 }
  0xe6   : > { %v2816_v37 = vpop.f32.mrf.mxu2  ;;  %v768_v39 = vpop.f32.mrf.mxu0 }
  0xe7   : > { %v2818_v38 = vpop.f32.mrf.mxu3  ;;  %v797_v40 = vpop.f32.mrf.mxu1  ;;  %v769_v14 = vadd.f32 %v768_v39, %v2832_v59  ;;  %v764_v39 = vadd.f32 %v2804_v32, %v2856_v25 }
  0xe8   : > { %v798_v15 = vadd.f32 %v797_v40, %v2832_v59 }
  0xee   : > { %v2820_v41 = vpop.f32.mrf.mxu2  ;;  %v770_v43 = vpop.f32.mrf.mxu0 }
  0xef   : > { %v2822_v42 = vpop.f32.mrf.mxu3  ;;  %v799_v44 = vpop.f32.mrf.mxu1  ;;  %v771_v16 = vadd.f32 %v770_v43, %v2846_v13 }
  0xf0   : > { %v800_v19 = vadd.f32 %v799_v44, %v2846_v13 }
  0xf1   : > { %v1002_v40 = vpack.c.bf16 %v771_v16, %v769_v14 }
  0xf6   : > { %v2824_v45 = vpop.f32.mrf.mxu2  ;;  %v773_v47 = vpop.f32.mrf.mxu0 }
  0xf7   : > { %v2826_v46 = vpop.f32.mrf.mxu3  ;;  %v802_v48 = vpop.f32.mrf.mxu1  ;;  %v774_v7 = vadd.f32 %v773_v47, %v2830_v54  ;;  %v766_v47 = vadd.f32 %v2812_v35, %v2862_v29  ;;  %v829_v32 = vadd.f32 %v2824_v45, %v2846_v13  ;;  %v2891_v45 = vld [vmem:[%s3526_s3] sm:$0xff] }
  0xf8   : > { %v803_v10 = vadd.f32 %v802_v48, %v2830_v54  ;;  %v1003_v48 = vpack.c.bf16 %v800_v19, %v798_v15  ;;  %v858_v35 = vadd.f32 %v2826_v46, %v2846_v13  ;;  %v856_v46 = vadd.f32 %v2822_v42, %v2832_v59 }
  0xf9   : > { %v851_v42 = vadd.f32 %v2810_v34, %v2856_v25 }
  0xfe   : > { %v831_v49 = vpop.f32.mrf.mxu2  ;;  %v775_v51 = vpop.f32.mrf.mxu0 }
  0xff   : > { %v860_v50 = vpop.f32.mrf.mxu3  ;;  %v804_v52 = vpop.f32.mrf.mxu1  ;;  %v776_v8 = vadd.f32 %v775_v51, %v2836_v61  ;;  %v832_v51 = vadd.f32 %v831_v49, %v2830_v54 }
 0x100   : > { %v805_v11 = vadd.f32 %v804_v52, %v2836_v61  ;;  %v793_v52 = vadd.f32 %v2806_v6, %v2856_v25  ;;  %v827_v6 = vadd.f32 %v2820_v41, %v2832_v59  ;;  %v824_v41 = vadd.f32 %v2816_v37, %v2862_v29 }
 0x101   : > { %v1010_v17 = vpack.c.bf16 %v776_v8, %v774_v7 }
 0x102   : > { %v1011_v20 = vpack.c.bf16 %v805_v11, %v803_v10  ;;  %v2924_v11 = vld [vmem:[%s3526_s3 + $0x8] sm:$0xff] }
 0x106   : > { %v833_v55 = vpop.f32.mrf.mxu2  ;;  %v778_v57 = vpop.f32.mrf.mxu0 }
 0x107   : > { %v862_v56 = vpop.f32.mrf.mxu3  ;;  %v807_v58 = vpop.f32.mrf.mxu1  ;;  %v779_v1 = vadd.f32 %v778_v57, %v2828_v53  ;;  %v834_v30 = vadd.f32 %v833_v55, %v2836_v61  ;;  %v795_v55 = vadd.f32 %v2814_v36, %v2862_v29  ;;  %v861_v57 = vadd.f32 %v860_v50, %v2830_v54 }
 0x108   : > { %v808_v4 = vadd.f32 %v807_v58, %v2828_v53  ;;  %v863_v43 = vadd.f32 %v862_v56, %v2836_v61 }
 0x109   : > { %v1012_v56 = vpack.c.bf16 %v834_v30, %v832_v51 }
 0x10a   : > { %v1013_v49 = vpack.c.bf16 %v863_v43, %v861_v57  ;;  %v2954_v43 = vld [vmem:[%s3526_s3 + $0x18] sm:$0xff] }
 0x10e   : > { %v836_v62 = vpop.f32.mrf.mxu2  ;;  %v780_v0 = vpop.f32.mrf.mxu0 }
 0x10f   : > { %v865_v63 = vpop.f32.mrf.mxu3  ;;  %v781_v2 = vadd.f32 %v780_v0, %v2834_v60  ;;  %v809_v3 = vpop.f32.mrf.mxu1  ;;  %v837_v21 = vadd.f32 %v836_v62, %v2828_v53  ;;  %v994_v62 = vpack.c.bf16 %v766_v47, %v764_v39 }
 0x110   : > { %v810_v5 = vadd.f32 %v809_v3, %v2834_v60  ;;  %v866_v26 = vadd.f32 %v865_v63, %v2828_v53  ;;  %v995_v63 = vpack.c.bf16 %v795_v55, %v793_v52  ;;  %v1005_v3 = vpack.c.bf16 %v858_v35, %v856_v46 }
 0x111   : > { %v1018_v9 = vpack.c.bf16 %v781_v2, %v779_v1  ;;  %v1004_v1 = vpack.c.bf16 %v829_v32, %v827_v6  ;;  %v853_v2 = vadd.f32 %v2818_v38, %v2862_v29 }
 0x112   : > { %v1019_v12 = vpack.c.bf16 %v810_v5, %v808_v4  ;;  %v822_v4 = vadd.f32 %v2808_v33, %v2856_v25 }
 0x113   : > { %1111 = vmatpush.bf16.msra.mxu0 %v1018_v9  ;;  %v997_v5 = vpack.c.bf16 %v853_v2, %v851_v42 }
 0x114   : > { %1140 = vmatpush.bf16.msra.mxu1 %v1019_v12  ;;  %v996_v37 = vpack.c.bf16 %v824_v41, %v822_v4 }
 0x116   : > { %v838_v18 = vpop.f32.mrf.mxu2  ;;  %v2854_v24 = vpop.f32.mrf.mxu0 }
 0x117   : > { %v839_v22 = vadd.f32 %v838_v18, %v2834_v60  ;;  %v867_v23 = vpop.f32.mrf.mxu3  ;;  %v2860_v28 = vpop.f32.mrf.mxu1  ;;  %1112 = vmatpush.bf16.msra.mxu0 %v1010_v17 }
 0x118   : > { %v868_v27 = vadd.f32 %v867_v23, %v2834_v60  ;;  %1141 = vmatpush.bf16.msra.mxu1 %v1011_v20 }
 0x119   : > { %v1020_v31 = vpack.c.bf16 %v839_v22, %v837_v21  ;;  %v2941_v21 = vld [vmem:[%s3526_s3 + $0x10] sm:$0xff] }
 0x11a   : > { %v1021_v44 = vpack.c.bf16 %v868_v27, %v866_v26 }
 0x11b   : > { %1169 = vmatpush.bf16.msra.mxu2 %v1020_v31  ;;  %1113 = vmatpush.bf16.msra.mxu0 %v1002_v40 }
 0x11c   : > { %1198 = vmatpush.bf16.msra.mxu3 %v1021_v44  ;;  %1142 = vmatpush.bf16.msra.mxu1 %v1003_v48 }
 0x11e   : > { %v2880_v58 = vpop.f32.mrf.mxu2  ;;  %v2886_v50 = vpop.f32.mrf.mxu0 }
 0x11f   : > { %v2884_v36 = vpop.f32.mrf.mxu3  ;;  %1170 = vmatpush.bf16.msra.mxu2 %v1012_v56  ;;  %v2895_v0 = vpop.f32.mrf.mxu1  ;;  %1114 = vmatpush.bf16.msra.mxu0 %v994_v62 }
 0x120   : > { %1199 = vmatpush.bf16.msra.mxu3 %v1013_v49  ;;  %1143 = vmatpush.bf16.msra.mxu1 %v995_v63 }
 0x122   : > { %2139 = vmatmul.msk.bf16.vlgmr.msra.gmra.mxu0 %vm1094_vm1, %v2891_v45 }
 0x123   : > { %1171 = vmatpush.bf16.msra.mxu2 %v1004_v1  ;;  %2143 = vmatmul.msk.bf16.vlgmr.msra.gmra.mxu1 %vm1094_vm1, %v2891_v45 }
 0x124   : > { %1200 = vmatpush.bf16.msra.mxu3 %v1005_v3 }
 0x126   : > { %v2909_v7 = vpop.f32.mrf.mxu2  ;;  %v884_v8 = vpop.f32.mrf.mxu0 }
 0x127   : > { %v2911_v38 = vpop.f32.mrf.mxu3  ;;  %1172 = vmatpush.bf16.msra.mxu2 %v996_v37  ;;  %v913_v33 = vpop.f32.mrf.mxu1  ;;  %v885_v4 = vadd.f32 %v884_v8, %v2832_v59 }
 0x128   : > { %1201 = vmatpush.bf16.msra.mxu3 %v997_v5  ;;  %v914_v5 = vadd.f32 %v913_v33, %v2832_v59 }
 0x12a   : > { %2147 = vmatmul.msk.bf16.vlgmr.msra.gmra.mxu2 %vm1094_vm1, %v2891_v45 }
 0x12b   : > { %2151 = vmatmul.msk.bf16.vlgmr.msra.gmra.mxu3 %vm1094_vm1, %v2891_v45 }
 0x12e   : > { %v2917_v34 = vpop.f32.mrf.mxu2  ;;  %v886_v10 = vpop.f32.mrf.mxu0 }
 0x12f   : > { %v2919_v9 = vpop.f32.mrf.mxu3  ;;  %v915_v12 = vpop.f32.mrf.mxu1  ;;  %v887_v62 = vadd.f32 %v886_v10, %v2846_v13 }
 0x130   : > { %v916_v46 = vadd.f32 %v915_v12, %v2846_v13  ;;  %v882_v12 = vadd.f32 %v2886_v50, %v2862_v29  ;;  %v880_v50 = vadd.f32 %v2854_v24, %v2856_v25  ;;  %v943_v24 = vadd.f32 %v2917_v34, %v2832_v59 }
 0x132   : > { %2140 = vmatmul.msk.bf16.gmra.mxu0 %vm1094_vm1, %v2924_v11 }
 0x133   : > { %2144 = vmatmul.msk.bf16.gmra.mxu1 %vm1094_vm1, %v2924_v11 }
 0x136   : > { %v2930_v14 = vpop.f32.mrf.mxu2  ;;  %v889_v16 = vpop.f32.mrf.mxu0 }
 0x137   : > { %v2932_v15 = vpop.f32.mrf.mxu3  ;;  %v918_v17 = vpop.f32.mrf.mxu1  ;;  %v890_v35 = vadd.f32 %v889_v16, %v2830_v54 }
 0x138   : > { %v919_v49 = vadd.f32 %v918_v17, %v2830_v54  ;;  %v1006_v17 = vpack.c.bf16 %v887_v62, %v885_v4 }
 0x13a   : > { %2148 = vmatmul.msk.bf16.gmra.mxu2 %vm1094_vm1, %v2924_v11 }
 0x13b   : > { %2152 = vmatmul.msk.bf16.gmra.mxu3 %vm1094_vm1, %v2924_v11 }
 0x13e   : > { %v947_v18 = vpop.f32.mrf.mxu2  ;;  %v891_v20 = vpop.f32.mrf.mxu0 }
 0x13f   : > { %v976_v19 = vpop.f32.mrf.mxu3  ;;  %v920_v22 = vpop.f32.mrf.mxu1  ;;  %v892_v55 = vadd.f32 %v891_v20, %v2836_v61  ;;  %v948_v8 = vadd.f32 %v947_v18, %v2830_v54  ;;  %v998_v18 = vpack.c.bf16 %v882_v12, %v880_v50 }
 0x140   : > { %v921_v32 = vadd.f32 %v920_v22, %v2836_v61  ;;  %v977_v33 = vadd.f32 %v976_v19, %v2830_v54  ;;  %v972_v54 = vadd.f32 %v2919_v9, %v2832_v59  ;;  %v969_v19 = vadd.f32 %v2911_v38, %v2862_v29 }
 0x141   : > { %v1014_v6 = vpack.c.bf16 %v892_v55, %v890_v35  ;;  %v967_v59 = vadd.f32 %v2884_v36, %v2856_v25  ;;  %v3066_v35 = vpop.permute.xlu2 %1066 }
 0x142   : > { %2141 = vmatmul.msk.bf16.gmra.mxu0 %vm1094_vm1, %v2941_v21  ;;  %v1015_v41 = vpack.c.bf16 %v921_v32, %v919_v49  ;;  %v3062_v32 = vpop.permute.xlu0 %1071 }
 0x143   : > { %2145 = vmatmul.msk.bf16.gmra.mxu1 %vm1094_vm1, %v2941_v21  ;;  %v1001_v34 = vpack.c.bf16 %v969_v19, %v967_v59 }
 0x146   : > { %v949_v23 = vpop.f32.mrf.mxu2  ;;  %v894_v27 = vpop.f32.mrf.mxu0 }
 0x147   : > { %v978_v26 = vpop.f32.mrf.mxu3  ;;  %v923_v30 = vpop.f32.mrf.mxu1  ;;  %v895_v44 = vadd.f32 %v894_v27, %v2828_v53  ;;  %v950_v10 = vadd.f32 %v949_v23, %v2836_v61 }
 0x148   : > { %v924_v51 = vadd.f32 %v923_v30, %v2828_v53  ;;  %v979_v20 = vadd.f32 %v978_v26, %v2836_v61  ;;  %v909_v61 = vadd.f32 %v2860_v28, %v2856_v25  ;;  %v974_v26 = vadd.f32 %v2932_v15, %v2846_v13 }
 0x149   : > { %v1016_v23 = vpack.c.bf16 %v950_v10, %v948_v8  ;;  %v940_v28 = vadd.f32 %v2909_v7, %v2862_v29  ;;  %v938_v15 = vadd.f32 %v2880_v58, %v2856_v25 }
 0x14a   : > { %2149 = vmatmul.msk.bf16.gmra.mxu2 %vm1094_vm1, %v2941_v21  ;;  %v1017_v27 = vpack.c.bf16 %v979_v20, %v977_v33 }
 0x14b   : > { %2153 = vmatmul.msk.bf16.gmra.mxu3 %vm1094_vm1, %v2941_v21  ;;  %v1000_v7 = vpack.c.bf16 %v940_v28, %v938_v15 }
 0x14e   : > { %v952_v31 = vpop.f32.mrf.mxu2  ;;  %v896_v40 = vpop.f32.mrf.mxu0 }
 0x14f   : > { %v981_v39 = vpop.f32.mrf.mxu3  ;;  %v897_v47 = vadd.f32 %v896_v40, %v2834_v60  ;;  %v925_v48 = vpop.f32.mrf.mxu1  ;;  %v953_v1 = vadd.f32 %v952_v31, %v2828_v53 }
 0x150   : > { %v926_v52 = vadd.f32 %v925_v48, %v2834_v60  ;;  %v982_v42 = vadd.f32 %v981_v39, %v2828_v53  ;;  %v911_v53 = vadd.f32 %v2895_v0, %v2862_v29  ;;  %v945_v0 = vadd.f32 %v2930_v14, %v2846_v13 }
 0x151   : > { %v1022_v57 = vpack.c.bf16 %v897_v47, %v895_v44  ;;  %v1009_v13 = vpack.c.bf16 %v974_v26, %v972_v54 }
 0x152   : > { %v1023_v56 = vpack.c.bf16 %v926_v52, %v924_v51  ;;  %2142 = vmatmul.msk.bf16.gmra.mxu0 %vm1094_vm1, %v2954_v43  ;;  %v999_v30 = vpack.c.bf16 %v911_v53, %v909_v61  ;;  %v1008_v14 = vpack.c.bf16 %v945_v0, %v943_v24 }
 0x153   : > { %2146 = vmatmul.msk.bf16.gmra.mxu1 %vm1094_vm1, %v2954_v43  ;;  %1227 = vmatpush.bf16.msrb.mxu0 %v1022_v57 }
 0x154   : > { %1256 = vmatpush.bf16.msrb.mxu1 %v1023_v56 }
 0x156   : > { %v954_v63 = vpop.f32.mrf.mxu2 }
 0x157   : > { %v955_v2 = vadd.f32 %v954_v63, %v2834_v60  ;;  %v983_v3 = vpop.f32.mrf.mxu3  ;;  %1228 = vmatpush.bf16.msrb.mxu0 %v1014_v6  ;;  %v3070_v63 = vpop.permute.xlu1 %1056 }
 0x158   : > { %v984_v37 = vadd.f32 %v983_v3, %v2834_v60  ;;  %1257 = vmatpush.bf16.msrb.mxu1 %v1015_v41  ;;  %v1007_v60 = vpack.c.bf16 %v916_v46, %v914_v5  ;;  %v3072_v41 = vpop.permute.xlu0 %1046  ;;  %v3075_v3 = vpop.permute.xlu2 %1061 }
 0x159   : > { %v1024_v16 = vpack.c.bf16 %v955_v2, %v953_v1 }
 0x15a   : > { %v1025_v22 = vpack.c.bf16 %v984_v37, %v982_v42  ;;  %2150 = vmatmul.msk.bf16.gmra.mxu2 %vm1094_vm1, %v2954_v43 }
 0x15b   : > { %2154 = vmatmul.msk.bf16.gmra.mxu3 %vm1094_vm1, %v2954_v43  ;;  %1285 = vmatpush.bf16.msrb.mxu2 %v1024_v16 }
 0x15c   : > { %1314 = vmatpush.bf16.msrb.mxu3 %v1025_v22  ;;  %1229 = vmatpush.bf16.msrb.mxu0 %v1006_v17 }
 0x15d   : > { %1258 = vmatpush.bf16.msrb.mxu1 %v1007_v60 }
 0x15f   : > { %1286 = vmatpush.bf16.msrb.mxu2 %v1016_v23  ;;  %v3083_v53 = vpop.permute.xlu1 %1051 }
 0x160   : > { %1315 = vmatpush.bf16.msrb.mxu3 %v1017_v27  ;;  %1230 = vmatpush.bf16.msrb.mxu0 %v998_v18  ;;  %v3089_v28 = vpop.permute.xlu0 %1041 }
 0x161   : > { %1259 = vmatpush.bf16.msrb.mxu1 %v999_v30 }
 0x163   : > { %1287 = vmatpush.bf16.msrb.mxu2 %v1008_v14  ;;  %2155 = vmatmul.msk.bf16.vlgmr.msrb.gmra.mxu0 %vm1094_vm1, %v2891_v45 }
 0x164   : > { %1316 = vmatpush.bf16.msrb.mxu3 %v1009_v13  ;;  %2159 = vmatmul.msk.bf16.vlgmr.msrb.gmra.mxu1 %vm1094_vm1, %v2891_v45 }
 0x167   : > { %1288 = vmatpush.bf16.msrb.mxu2 %v1000_v7 }
 0x168   : > { %1317 = vmatpush.bf16.msrb.mxu3 %v1001_v34 }
 0x16a   : > { %2163 = vmatmul.msk.bf16.vlgmr.msrb.gmra.mxu2 %vm1094_vm1, %v2891_v45 }
 0x16b   : > { %2167 = vmatmul.msk.bf16.vlgmr.msrb.gmra.mxu3 %vm1094_vm1, %v2891_v45 }
 0x173   : > { %2156 = vmatmul.msk.bf16.gmra.mxu0 %vm1094_vm1, %v2924_v11 }
 0x174   : > { %2160 = vmatmul.msk.bf16.gmra.mxu1 %vm1094_vm1, %v2924_v11 }
 0x17a   : > { %2164 = vmatmul.msk.bf16.gmra.mxu2 %vm1094_vm1, %v2924_v11 }
 0x17b   : > { %2168 = vmatmul.msk.bf16.gmra.mxu3 %vm1094_vm1, %v2924_v11 }
 0x183   : > { %2157 = vmatmul.msk.bf16.gmra.mxu0 %vm1094_vm1, %v2941_v21 }
 0x184   : > { %2161 = vmatmul.msk.bf16.gmra.mxu1 %vm1094_vm1, %v2941_v21 }
 0x18a   : > { %2165 = vmatmul.msk.bf16.gmra.mxu2 %vm1094_vm1, %v2941_v21 }
 0x18b   : > { %2169 = vmatmul.msk.bf16.gmra.mxu3 %vm1094_vm1, %v2941_v21 }
 0x193   : > { %2158 = vmatmul.msk.bf16.gmra.mxu0 %vm1094_vm1, %v2954_v43 }
 0x194   : > { %2162 = vmatmul.msk.bf16.gmra.mxu1 %vm1094_vm1, %v2954_v43 }
 0x19a   : > { %2166 = vmatmul.msk.bf16.gmra.mxu2 %vm1094_vm1, %v2954_v43 }
 0x19b   : > { %2170 = vmatmul.msk.bf16.gmra.mxu3 %vm1094_vm1, %v2954_v43 }
 0x19f   : > { %v3040_v25 = vpop.f32.mrf.mxu0 }
 0x1a0   : > { %v3042_v29 = vpop.f32.mrf.mxu1 }
 0x1a7   : > { %v1118_v58 = vpop.f32.mrf.mxu0 }
 0x1a8   : > { %v3044_v36 = vpop.f32.mrf.mxu1  ;;  %v1119_v15 = vadd.f32 %v1118_v58, %v3089_v28 }
 0x1ad   : > { %v3046_v45 = vpop.f32.mrf.mxu2 }
 0x1ae   : > { %v3048_v38 = vpop.f32.mrf.mxu3 }
 0x1af   : > { %v1121_v9 = vpop.f32.mrf.mxu0 }
 0x1b0   : > { %v1150_v11 = vpop.f32.mrf.mxu1  ;;  %v1122_v24 = vadd.f32 %v1121_v9, %v3072_v41  ;;  %v1148_v9 = vadd.f32 %v3044_v36, %v3089_v28 }
 0x1b1   : > { %v1151_v14 = vadd.f32 %v1150_v11, %v3072_v41 }
 0x1b2   : > { %v1348_v36 = vmax.f32 %v1148_v9, 0.0 }
 0x1b3   : > { %v1356_v58 = vmax.f32 %v1151_v14, 0.0 }
 0x1b5   : > { %v3050_v21 = vpop.f32.mrf.mxu2 }
 0x1b6   : > { %v3052_v31 = vpop.f32.mrf.mxu3 }
 0x1b7   : > { %v1123_v39 = vpop.f32.mrf.mxu0 }
 0x1b8   : > { %v1152_v40 = vpop.f32.mrf.mxu1  ;;  %v1124_v33 = vadd.f32 %v1123_v39, %v3083_v53  ;;  %v3097_v39 = vpop.permute.xlu2 %1036 }
 0x1b9   : > { %v1153_v18 = vadd.f32 %v1152_v40, %v3083_v53  ;;  %v1117_v11 = vadd.f32 %v3040_v25, %v3097_v39  ;;  %v1175_v9 = vadd.f32 %v3046_v45, %v3097_v39 }
 0x1ba   : > { %v1363_v59 = vmax.f32 %v1124_v33, 0.0 }
 0x1bb   : > { %v1364_v40 = vmax.f32 %v1153_v18, 0.0 }
 0x1bd   : > { %v3054_v43 = vpop.f32.mrf.mxu2 }
 0x1be   : > { %v3056_v44 = vpop.f32.mrf.mxu3 }
 0x1bf   : > { %v1126_v47 = vpop.f32.mrf.mxu0 }
 0x1c0   : > { %v1155_v48 = vpop.f32.mrf.mxu1  ;;  %v1127_v17 = vadd.f32 %v1126_v47, %v3070_v63 }
 0x1c1   : > { %v1156_v60 = vadd.f32 %v1155_v48, %v3070_v63  ;;  %v1355_v48 = vmax.f32 %v1122_v24, 0.0 }
 0x1c2   : > { %v1371_v54 = vmax.f32 %v1127_v17, 0.0 }
 0x1c3   : > { %v1372_v19 = vmax.f32 %v1156_v60, 0.0 }
 0x1c5   : > { %v3058_v51 = vpop.f32.mrf.mxu2 }
 0x1c6   : > { %v3060_v52 = vpop.f32.mrf.mxu3 }
 0x1c7   : > { %v1128_v55 = vpop.f32.mrf.mxu0 }
 0x1c8   : > { %v1157_v57 = vpop.f32.mrf.mxu1  ;;  %v1129_v37 = vadd.f32 %v1128_v55, %v3075_v3  ;;  %v1146_v55 = vadd.f32 %v3042_v29, %v3097_v39 }
 0x1c9   : > { %v1158_v16 = vadd.f32 %v1157_v57, %v3075_v3 }
 0x1ca   : > { %v1379_v61 = vmax.f32 %v1129_v37, 0.0 }
 0x1cb   : > { %v1380_v26 = vmax.f32 %v1158_v16, 0.0 }
 0x1cc   : > { %v1428_v34 = vpack.c.bf16 %v1379_v61, %v1371_v54  ;;  %v1182_v61 = vadd.f32 %v3058_v51, %v3083_v53  ;;  %v1209_v51 = vadd.f32 %v3056_v44, %v3072_v41 }
 0x1cd   : > { %v3064_v56 = vpop.f32.mrf.mxu2  ;;  %v1429_v47 = vpack.c.bf16 %v1380_v26, %v1372_v19  ;;  %v1211_v26 = vadd.f32 %v3060_v52, %v3083_v53  ;;  %v1177_v19 = vadd.f32 %v3050_v21, %v3089_v28 }
 0x1ce   : > { %v3068_v49 = vpop.f32.mrf.mxu3  ;;  %v1185_v17 = vadd.f32 %v3064_v56, %v3070_v63  ;;  %v3124_v56 = vld [vmem:[%s3526_s3 + $0x20] sm:$0xff]  ;;  %v1365_v52 = vmax.f32 %v1182_v61, 0.0 }
 0x1cf   : > { %v1131_v62 = vpop.f32.mrf.mxu0 }
 0x1d0   : > { %v1160_v6 = vpop.f32.mrf.mxu1  ;;  %v1132_v2 = vadd.f32 %v1131_v62, %v3066_v35  ;;  %v1347_v62 = vmax.f32 %v1119_v15, 0.0  ;;  %v1373_v24 = vmax.f32 %v1185_v17, 0.0 }
 0x1d1   : > { %v1161_v4 = vadd.f32 %v1160_v6, %v3066_v35 }
 0x1d2   : > { %v1387_v20 = vmax.f32 %v1132_v2, 0.0 }
 0x1d3   : > { %v1388_v8 = vmax.f32 %v1161_v4, 0.0  ;;  %v1420_v4 = vpack.c.bf16 %v1363_v59, %v1355_v48  ;;  %v1206_v59 = vadd.f32 %v3052_v31, %v3089_v28  ;;  %v1349_v31 = vmax.f32 %v1177_v19, 0.0 }
 0x1d5   : > { %v1186_v46 = vpop.f32.mrf.mxu2 }
 0x1d6   : > { %v1215_v1 = vpop.f32.mrf.mxu3 }
 0x1d7   : > { %v1133_v42 = vpop.f32.mrf.mxu0  ;;  %v1216_v16 = vadd.f32 %v1215_v1, %v3075_v3 }
 0x1d8   : > { %v1134_v5 = vadd.f32 %v1133_v42, %v3062_v32  ;;  %v1162_v10 = vpop.f32.mrf.mxu1  ;;  %v1187_v42 = vadd.f32 %v1186_v46, %v3075_v3  ;;  %v1214_v46 = vadd.f32 %v3068_v49, %v3070_v63 }
 0x1d9   : > { %v1163_v12 = vadd.f32 %v1162_v10, %v3062_v32  ;;  %v1339_v10 = vmax.f32 %v1117_v11, 0.0  ;;  %v1382_v49 = vmax.f32 %v1216_v16, 0.0  ;;  %v1358_v11 = vmax.f32 %v1209_v51, 0.0 }
 0x1da   : > { %v1395_v22 = vmax.f32 %v1134_v5, 0.0  ;;  %v1421_v5 = vpack.c.bf16 %v1364_v40, %v1356_v58  ;;  %v1374_v54 = vmax.f32 %v1214_v46, 0.0  ;;  %v1350_v58 = vmax.f32 %v1206_v59, 0.0 }
 0x1db   : > { %v1396_v50 = vmax.f32 %v1163_v12, 0.0  ;;  %v1340_v12 = vmax.f32 %v1146_v55, 0.0  ;;  %v1412_v1 = vpack.c.bf16 %v1347_v62, %v1339_v10  ;;  %v1341_v62 = vmax.f32 %v1175_v9, 0.0 }
 0x1dc   : > { %v1436_v0 = vpack.c.bf16 %v1395_v22, %v1387_v20  ;;  %v1431_v44 = vpack.c.bf16 %v1382_v49, %v1374_v54  ;;  %v3203_v54 = vld [vmem:[%s3526_s3 + $0x38] sm:$0xff] }
 0x1dd   : > { %v1189_v23 = vpop.f32.mrf.mxu2  ;;  %v1437_v27 = vpack.c.bf16 %v1396_v50, %v1388_v8  ;;  %v1413_v18 = vpack.c.bf16 %v1348_v36, %v1340_v12 }
 0x1de   : > { %v1218_v30 = vpop.f32.mrf.mxu3  ;;  %1529 = vmatpush.bf16.msra.mxu0 %v1436_v0  ;;  %v1190_v57 = vadd.f32 %v1189_v23, %v3066_v35  ;;  %v1381_v0 = vmax.f32 %v1187_v42, 0.0 }
 0x1df   : > { %1558 = vmatpush.bf16.msra.mxu1 %v1437_v27  ;;  %v1219_v6 = vadd.f32 %v1218_v30, %v3066_v35  ;;  %v1180_v30 = vadd.f32 %v3054_v43, %v3072_v41 }
 0x1e0   : > { %v3092_v13 = vpop.f32.mrf.mxu0  ;;  %v1389_v20 = vmax.f32 %v1190_v57, 0.0  ;;  %v1430_v43 = vpack.c.bf16 %v1381_v0, %v1373_v24 }
 0x1e1   : > { %v3095_v7 = vpop.f32.mrf.mxu1  ;;  %v1390_v8 = vmax.f32 %v1219_v6, 0.0  ;;  %v1357_v40 = vmax.f32 %v1180_v30, 0.0 }
 0x1e2   : > { %1530 = vmatpush.bf16.msra.mxu0 %v1428_v34  ;;  %v1366_v34 = vmax.f32 %v1211_v26, 0.0 }
 0x1e3   : > { %1559 = vmatpush.bf16.msra.mxu1 %v1429_v47  ;;  %v1204_v47 = vadd.f32 %v3048_v38, %v3097_v39  ;;  %v1422_v55 = vpack.c.bf16 %v1365_v52, %v1357_v40 }
 0x1e4   : > { %v1423_v57 = vpack.c.bf16 %v1366_v34, %v1358_v11 }
 0x1e5   : > { %v1191_v2 = vpop.f32.mrf.mxu2  ;;  %v1342_v6 = vmax.f32 %v1204_v47, 0.0 }
 0x1e6   : > { %v1192_v37 = vadd.f32 %v1191_v2, %v3062_v32  ;;  %v1220_v25 = vpop.f32.mrf.mxu3  ;;  %1531 = vmatpush.bf16.msra.mxu0 %v1420_v4  ;;  %v1414_v4 = vpack.c.bf16 %v1349_v31, %v1341_v62 }
 0x1e7   : > { %v1221_v29 = vadd.f32 %v1220_v25, %v3062_v32  ;;  %1560 = vmatpush.bf16.msra.mxu1 %v1421_v5  ;;  %v1415_v36 = vpack.c.bf16 %v1350_v58, %v1342_v6 }
 0x1e8   : > { %v1397_v22 = vmax.f32 %v1192_v37, 0.0  ;;  %v3113_v60 = vpop.f32.mrf.mxu0  ;;  %v3159_v37 = vld [vmem:[%s3526_s3 + $0x28] sm:$0xff] }
 0x1e9   : > { %v1398_v50 = vmax.f32 %v1221_v29, 0.0  ;;  %v3117_v33 = vpop.f32.mrf.mxu1 }
 0x1ea   : > { %v1438_v23 = vpack.c.bf16 %v1397_v22, %v1389_v20  ;;  %1532 = vmatpush.bf16.msra.mxu0 %v1412_v1  ;;  %v3180_v22 = vld [vmem:[%s3526_s3 + $0x30] sm:$0xff] }
 0x1eb   : > { %v1439_v27 = vpack.c.bf16 %v1398_v50, %v1390_v8  ;;  %1561 = vmatpush.bf16.msra.mxu1 %v1413_v18 }
 0x1ec   : > { %1587 = vmatpush.bf16.msra.mxu2 %v1438_v23 }
 0x1ed   : > { %1616 = vmatpush.bf16.msra.mxu3 %v1439_v27  ;;  %v3132_v14 = vpop.f32.mrf.mxu2  ;;  %2203 = vmatmul.msk.bf16.vlgmr.msra.gmra.mxu0 %vm1094_vm1, %v3124_v56 }
 0x1ee   : > { %v3136_v15 = vpop.f32.mrf.mxu3  ;;  %2207 = vmatmul.msk.bf16.vlgmr.msra.gmra.mxu1 %vm1094_vm1, %v3124_v56 }
 0x1f0   : > { %1588 = vmatpush.bf16.msra.mxu2 %v1430_v43  ;;  %v3146_v21 = vpop.f32.mrf.mxu0 }
 0x1f1   : > { %1617 = vmatpush.bf16.msra.mxu3 %v1431_v44  ;;  %v3150_v48 = vpop.f32.mrf.mxu1  ;;  %v1238_v62 = vadd.f32 %v3146_v21, %v3072_v41  ;;  %v1264_v21 = vadd.f32 %v3117_v33, %v3089_v28 }
 0x1f4   : > { %1589 = vmatpush.bf16.msra.mxu2 %v1422_v55 }
 0x1f5   : > { %1618 = vmatpush.bf16.msra.mxu3 %v1423_v57  ;;  %v3152_v45 = vpop.f32.mrf.mxu2 }
 0x1f6   : > { %v3154_v2 = vpop.f32.mrf.mxu3 }
 0x1f8   : > { %1590 = vmatpush.bf16.msra.mxu2 %v1414_v4  ;;  %v1239_v38 = vpop.f32.mrf.mxu0  ;;  %v1235_v4 = vadd.f32 %v3113_v60, %v3089_v28  ;;  %v1262_v60 = vadd.f32 %v3095_v7, %v3097_v39 }
 0x1f9   : > { %1619 = vmatpush.bf16.msra.mxu3 %v1415_v36  ;;  %v1268_v42 = vpop.f32.mrf.mxu1  ;;  %v1240_v9 = vadd.f32 %v1239_v38, %v3083_v53  ;;  %v1267_v36 = vadd.f32 %v3150_v48, %v3072_v41 }
 0x1fa   : > { %v1269_v31 = vadd.f32 %v1268_v42, %v3083_v53 }
 0x1fb   : > { %2211 = vmatmul.msk.bf16.vlgmr.msra.gmra.mxu2 %vm1094_vm1, %v3124_v56  ;;  %v1367_v42 = vmax.f32 %v1240_v9, 0.0 }
 0x1fc   : > { %2215 = vmatmul.msk.bf16.vlgmr.msra.gmra.mxu3 %vm1094_vm1, %v3124_v56 }
 0x1fd   : > { %v3165_v25 = vpop.f32.mrf.mxu2  ;;  %2204 = vmatmul.msk.bf16.gmra.mxu0 %vm1094_vm1, %v3159_v37 }
 0x1fe   : > { %v3167_v5 = vpop.f32.mrf.mxu3  ;;  %2208 = vmatmul.msk.bf16.gmra.mxu1 %vm1094_vm1, %v3159_v37 }
 0x200   : > { %v1242_v10 = vpop.f32.mrf.mxu0 }
 0x201   : > { %v1271_v16 = vpop.f32.mrf.mxu1  ;;  %v1243_v19 = vadd.f32 %v1242_v10, %v3070_v63 }
 0x202   : > { %v1272_v59 = vadd.f32 %v1271_v16, %v3070_v63  ;;  %v1233_v16 = vadd.f32 %v3092_v13, %v3097_v39 }
 0x203   : > { %v1375_v6 = vmax.f32 %v1243_v19, 0.0 }
 0x204   : > { %v1376_v38 = vmax.f32 %v1272_v59, 0.0  ;;  %v1343_v13 = vmax.f32 %v1233_v16, 0.0 }
 0x205   : > { %v3173_v29 = vpop.f32.mrf.mxu2 }
 0x206   : > { %v3175_v12 = vpop.f32.mrf.mxu3 }
 0x208   : > { %v1244_v17 = vpop.f32.mrf.mxu0 }
 0x209   : > { %v1273_v20 = vpop.f32.mrf.mxu1  ;;  %v1245_v49 = vadd.f32 %v1244_v17, %v3075_v3  ;;  %v1368_v17 = vmax.f32 %v1269_v31, 0.0 }
 0x20a   : > { %v1274_v24 = vadd.f32 %v1273_v20, %v3075_v3 }
 0x20b   : > { %2212 = vmatmul.msk.bf16.gmra.mxu2 %vm1094_vm1, %v3159_v37  ;;  %v1383_v40 = vmax.f32 %v1245_v49, 0.0 }
 0x20c   : > { %2216 = vmatmul.msk.bf16.gmra.mxu3 %vm1094_vm1, %v3159_v37  ;;  %v1384_v55 = vmax.f32 %v1274_v24, 0.0 }
 0x20d   : > { %v3186_v46 = vpop.f32.mrf.mxu2  ;;  %2205 = vmatmul.msk.bf16.gmra.mxu0 %vm1094_vm1, %v3180_v22  ;;  %v1432_v10 = vpack.c.bf16 %v1383_v40, %v1375_v6 }
 0x20e   : > { %v3188_v8 = vpop.f32.mrf.mxu3  ;;  %2209 = vmatmul.msk.bf16.gmra.mxu1 %vm1094_vm1, %v3180_v22  ;;  %v1433_v20 = vpack.c.bf16 %v1384_v55, %v1376_v38 }
 0x210   : > { %v1247_v50 = vpop.f32.mrf.mxu0 }
 0x211   : > { %v1276_v1 = vpop.f32.mrf.mxu1  ;;  %v1248_v23 = vadd.f32 %v1247_v50, %v3066_v35  ;;  %v1359_v50 = vmax.f32 %v1238_v62, 0.0 }
 0x212   : > { %v1277_v18 = vadd.f32 %v1276_v1, %v3066_v35  ;;  %v1351_v1 = vmax.f32 %v1235_v4, 0.0 }
 0x213   : > { %v1391_v52 = vmax.f32 %v1248_v23, 0.0  ;;  %v1360_v23 = vmax.f32 %v1267_v36, 0.0  ;;  %v1424_v49 = vpack.c.bf16 %v1367_v42, %v1359_v50 }
 0x214   : > { %v1392_v34 = vmax.f32 %v1277_v18, 0.0 }
 0x215   : > { %v1302_v61 = vpop.f32.mrf.mxu2  ;;  %v1425_v24 = vpack.c.bf16 %v1368_v17, %v1360_v23 }
 0x216   : > { %v1331_v0 = vpop.f32.mrf.mxu3 }
 0x217   : > { %v1332_v19 = vadd.f32 %v1331_v0, %v3075_v3 }
 0x218   : > { %v1249_v26 = vpop.f32.mrf.mxu0 }
 0x219   : > { %v1250_v27 = vadd.f32 %v1249_v26, %v3062_v32  ;;  %v1278_v30 = vpop.f32.mrf.mxu1 }
 0x21a   : > { %v1279_v51 = vadd.f32 %v1278_v30, %v3062_v32 }
 0x21b   : > { %v1399_v43 = vmax.f32 %v1250_v27, 0.0  ;;  %2213 = vmatmul.msk.bf16.gmra.mxu2 %vm1094_vm1, %v3180_v22  ;;  %v1352_v27 = vmax.f32 %v1264_v21, 0.0 }
 0x21c   : > { %v1400_v44 = vmax.f32 %v1279_v51, 0.0  ;;  %2217 = vmatmul.msk.bf16.gmra.mxu3 %vm1094_vm1, %v3180_v22  ;;  %v1303_v51 = vadd.f32 %v1302_v61, %v3075_v3  ;;  %v1298_v61 = vadd.f32 %v3173_v29, %v3083_v53  ;;  %v1325_v29 = vadd.f32 %v3167_v5, %v3072_v41 }
 0x21d   : > { %v1440_v47 = vpack.c.bf16 %v1399_v43, %v1391_v52  ;;  %v1305_v11 = vpop.f32.mrf.mxu2  ;;  %2206 = vmatmul.msk.bf16.gmra.mxu0 %vm1094_vm1, %v3203_v54  ;;  %v1344_v52 = vmax.f32 %v1262_v60, 0.0  ;;  %v1320_v5 = vadd.f32 %v3136_v15, %v3097_v39 }
 0x21e   : > { %v1441_v58 = vpack.c.bf16 %v1400_v44, %v1392_v34  ;;  %v1334_v57 = vpop.f32.mrf.mxu3  ;;  %2210 = vmatmul.msk.bf16.gmra.mxu1 %vm1094_vm1, %v3203_v54  ;;  %v1306_v48 = vadd.f32 %v1305_v11, %v3066_v35  ;;  %v1301_v34 = vadd.f32 %v3186_v46, %v3070_v63  ;;  %v1330_v44 = vadd.f32 %v3188_v8, %v3070_v63 }
 0x21f   : > { %1645 = vmatpush.bf16.msrb.mxu0 %v1440_v47  ;;  %v1335_v18 = vadd.f32 %v1334_v57, %v3066_v35  ;;  %v1416_v35 = vpack.c.bf16 %v1351_v1, %v1343_v13  ;;  %v1417_v0 = vpack.c.bf16 %v1352_v27, %v1344_v52  ;;  %v1385_v47 = vmax.f32 %v1303_v51, 0.0  ;;  %v3309_v13 = vpop.permute.xlu2 %1490  ;;  %v3315_v51 = vpop.permute.xlu0 %1475 }
 0x220   : > { %1674 = vmatpush.bf16.msrb.mxu1 %v1441_v58  ;;  %v1393_v43 = vmax.f32 %v1306_v48, 0.0  ;;  %v1386_v11 = vmax.f32 %v1332_v19, 0.0  ;;  %v1296_v63 = vadd.f32 %v3165_v25, %v3072_v41  ;;  %v1377_v46 = vmax.f32 %v1301_v34, 0.0 }
 0x221   : > { %v1394_v9 = vmax.f32 %v1335_v18, 0.0  ;;  %v1378_v8 = vmax.f32 %v1330_v44, 0.0  ;;  %v1369_v55 = vmax.f32 %v1298_v61, 0.0  ;;  %v1291_v41 = vadd.f32 %v3132_v14, %v3097_v39 }
 0x222   : > { %v1434_v57 = vpack.c.bf16 %v1385_v47, %v1377_v46  ;;  %v1362_v62 = vmax.f32 %v1325_v29, 0.0  ;;  %v1346_v38 = vmax.f32 %v1320_v5, 0.0 }
 0x223   : > { %1646 = vmatpush.bf16.msrb.mxu0 %v1432_v10  ;;  %v1435_v25 = vpack.c.bf16 %v1386_v11, %v1378_v8  ;;  %v1345_v36 = vmax.f32 %v1291_v41, 0.0 }
 0x224   : > { %1675 = vmatpush.bf16.msrb.mxu1 %v1433_v20 }
 0x225   : > { %v1307_v26 = vpop.f32.mrf.mxu2 }
 0x226   : > { %v1308_v33 = vadd.f32 %v1307_v26, %v3062_v32  ;;  %v1336_v30 = vpop.f32.mrf.mxu3 }
 0x227   : > { %v1337_v7 = vadd.f32 %v1336_v30, %v3062_v32  ;;  %1647 = vmatpush.bf16.msrb.mxu0 %v1424_v49  ;;  %v1327_v32 = vadd.f32 %v3175_v12, %v3083_v53  ;;  %v1293_v53 = vadd.f32 %v3152_v45, %v3089_v28  ;;  %v1322_v12 = vadd.f32 %v3154_v2, %v3089_v28  ;;  %v3321_v52 = vpop.permute.xlu2 %1465 }
 0x228   : > { %v1401_v59 = vmax.f32 %v1308_v33, 0.0  ;;  %1676 = vmatpush.bf16.msrb.mxu1 %v1425_v24  ;;  %v1361_v45 = vmax.f32 %v1296_v63, 0.0  ;;  %v3313_v33 = vpop.permute.xlu1 %1485 }
 0x229   : > { %v1402_v40 = vmax.f32 %v1337_v7, 0.0  ;;  %v1370_v58 = vmax.f32 %v1327_v32, 0.0  ;;  %v1353_v28 = vmax.f32 %v1293_v53, 0.0  ;;  %v1354_v2 = vmax.f32 %v1322_v12, 0.0 }
 0x22a   : > { %v1442_v3 = vpack.c.bf16 %v1401_v59, %v1393_v43  ;;  %v1426_v6 = vpack.c.bf16 %v1369_v55, %v1361_v45 }
 0x22b   : > { %v1443_v31 = vpack.c.bf16 %v1402_v40, %v1394_v9  ;;  %2214 = vmatmul.msk.bf16.gmra.mxu2 %vm1094_vm1, %v3203_v54  ;;  %1648 = vmatpush.bf16.msrb.mxu0 %v1416_v35  ;;  %v1427_v4 = vpack.c.bf16 %v1370_v58, %v1362_v62  ;;  %v1418_v42 = vpack.c.bf16 %v1353_v28, %v1345_v36 }
 0x22c   : > { %2218 = vmatmul.msk.bf16.gmra.mxu3 %vm1094_vm1, %v3203_v54  ;;  %1677 = vmatpush.bf16.msrb.mxu1 %v1417_v0  ;;  %v1419_v10 = vpack.c.bf16 %v1354_v2, %v1346_v38 }
 0x22d   : > { %1703 = vmatpush.bf16.msrb.mxu2 %v1442_v3  ;;  %1732 = vmatpush.bf16.msrb.mxu3 %v1443_v31  ;;  %v3332_v31 = vpop.permute.xlu0 %1470 }
 0x22e   : > { %2219 = vmatmul.msk.bf16.vlgmr.msrb.gmra.mxu0 %vm1094_vm1, %v3124_v56 }
 0x22f   : > { %2223 = vmatmul.msk.bf16.vlgmr.msrb.gmra.mxu1 %vm1094_vm1, %v3124_v56  ;;  %v3338_v45 = vpop.permute.xlu2 %1460 }
 0x230   : > { %v3324_v59 = vpop.permute.xlu1 %1480 }
 0x231   : > { %1704 = vmatpush.bf16.msrb.mxu2 %v1434_v57  ;;  %1733 = vmatpush.bf16.msrb.mxu3 %v1435_v25 }
 0x235   : > { %1705 = vmatpush.bf16.msrb.mxu2 %v1426_v6  ;;  %1734 = vmatpush.bf16.msrb.mxu3 %v1427_v4 }
 0x239   : > { %1706 = vmatpush.bf16.msrb.mxu2 %v1418_v42  ;;  %1735 = vmatpush.bf16.msrb.mxu3 %v1419_v10  ;;  %v3346_v42 = vpop.permute.xlu1 %1455 }
 0x23c   : > { %2227 = vmatmul.msk.bf16.vlgmr.msrb.gmra.mxu2 %vm1094_vm1, %v3124_v56  ;;  %2231 = vmatmul.msk.bf16.vlgmr.msrb.gmra.mxu3 %vm1094_vm1, %v3124_v56 }
 0x23e   : > { %2220 = vmatmul.msk.bf16.gmra.mxu0 %vm1094_vm1, %v3159_v37 }
 0x23f   : > { %2224 = vmatmul.msk.bf16.gmra.mxu1 %vm1094_vm1, %v3159_v37 }
 0x24c   : > { %2228 = vmatmul.msk.bf16.gmra.mxu2 %vm1094_vm1, %v3159_v37  ;;  %2232 = vmatmul.msk.bf16.gmra.mxu3 %vm1094_vm1, %v3159_v37 }
 0x24e   : > { %2221 = vmatmul.msk.bf16.gmra.mxu0 %vm1094_vm1, %v3180_v22 }
 0x24f   : > { %2225 = vmatmul.msk.bf16.gmra.mxu1 %vm1094_vm1, %v3180_v22 }
 0x25c   : > { %2229 = vmatmul.msk.bf16.gmra.mxu2 %vm1094_vm1, %v3180_v22  ;;  %2233 = vmatmul.msk.bf16.gmra.mxu3 %vm1094_vm1, %v3180_v22 }
 0x25e   : > { %2222 = vmatmul.msk.bf16.gmra.mxu0 %vm1094_vm1, %v3203_v54 }
 0x25f   : > { %2226 = vmatmul.msk.bf16.gmra.mxu1 %vm1094_vm1, %v3203_v54 }
 0x26a   : > { %v3287_v39 = vpop.f32.mrf.mxu0 }
 0x26b   : > { %v3293_v56 = vpop.f32.mrf.mxu1 }
 0x26c   : > { %2230 = vmatmul.msk.bf16.gmra.mxu2 %vm1094_vm1, %v3203_v54  ;;  %2234 = vmatmul.msk.bf16.gmra.mxu3 %vm1094_vm1, %v3203_v54 }
 0x272   : > { %v1536_v14 = vpop.f32.mrf.mxu0 }
 0x273   : > { %v1565_v15 = vpop.f32.mrf.mxu1  ;;  %v1537_v6 = vadd.f32 %v1536_v14, %v3338_v45 }
 0x274   : > { %v1566_v10 = vadd.f32 %v1565_v15, %v3338_v45 }
 0x27a   : > { %v1539_v37 = vpop.f32.mrf.mxu0 }
 0x27b   : > { %v1568_v22 = vpop.f32.mrf.mxu1  ;;  %v1540_v41 = vadd.f32 %v1539_v37, %v3321_v52 }
 0x27c   : > { %v1569_v62 = vadd.f32 %v1568_v22, %v3321_v52 }
 0x27d   : > { %v1773_v22 = vmax.f32 %v1540_v41, 0.0 }
 0x27e   : > { %v3295_v16 = vpop.f32.mrf.mxu2  ;;  %v1774_v14 = vmax.f32 %v1569_v62, 0.0 }
 0x27f   : > { %v3297_v21 = vpop.f32.mrf.mxu3 }
 0x282   : > { %v1541_v17 = vpop.f32.mrf.mxu0 }
 0x283   : > { %v1570_v20 = vpop.f32.mrf.mxu1  ;;  %v1542_v53 = vadd.f32 %v1541_v17, %v3332_v31 }
 0x284   : > { %v1571_v58 = vadd.f32 %v1570_v20, %v3332_v31  ;;  %v1535_v20 = vadd.f32 %v3287_v39, %v3346_v42 }
 0x285   : > { %v1781_v4 = vmax.f32 %v1542_v53, 0.0 }
 0x286   : > { %v3299_v50 = vpop.f32.mrf.mxu2  ;;  %v1782_v37 = vmax.f32 %v1571_v58, 0.0 }
 0x287   : > { %v3301_v60 = vpop.f32.mrf.mxu3 }
 0x28a   : > { %v1544_v1 = vpop.f32.mrf.mxu0 }
 0x28b   : > { %v1573_v23 = vpop.f32.mrf.mxu1  ;;  %v1545_v0 = vadd.f32 %v1544_v1, %v3315_v51 }
 0x28c   : > { %v1574_v63 = vadd.f32 %v1573_v23, %v3315_v51  ;;  %v1564_v23 = vadd.f32 %v3293_v56, %v3346_v42 }
 0x28d   : > { %v1789_v5 = vmax.f32 %v1545_v0, 0.0 }
 0x28e   : > { %v3303_v48 = vpop.f32.mrf.mxu2  ;;  %v1790_v28 = vmax.f32 %v1574_v63, 0.0  ;;  %v1758_v15 = vmax.f32 %v1564_v23, 0.0  ;;  %v1622_v23 = vadd.f32 %v3297_v21, %v3346_v42 }
 0x28f   : > { %v3305_v54 = vpop.f32.mrf.mxu3 }
 0x292   : > { %v1546_v18 = vpop.f32.mrf.mxu0 }
 0x293   : > { %v1575_v26 = vpop.f32.mrf.mxu1  ;;  %v1547_v44 = vadd.f32 %v1546_v18, %v3324_v59 }
 0x294   : > { %v1576_v61 = vadd.f32 %v1575_v26, %v3324_v59  ;;  %v1765_v26 = vmax.f32 %v1537_v6, 0.0 }
 0x295   : > { %v1797_v12 = vmax.f32 %v1547_v44, 0.0 }
 0x296   : > { %v3307_v49 = vpop.f32.mrf.mxu2  ;;  %v1798_v57 = vmax.f32 %v1576_v61, 0.0 }
 0x297   : > { %v3311_v27 = vpop.f32.mrf.mxu3  ;;  %v1838_v36 = vpack.c.bf16 %v1797_v12, %v1789_v5 }
 0x298   : > { %v1839_v17 = vpack.c.bf16 %v1798_v57, %v1790_v28 }
 0x29a   : > { %v1549_v30 = vpop.f32.mrf.mxu0 }
 0x29b   : > { %v1578_v24 = vpop.f32.mrf.mxu1  ;;  %v1550_v43 = vadd.f32 %v1549_v30, %v3313_v33  ;;  %v1830_v30 = vpack.c.bf16 %v1781_v4, %v1773_v22  ;;  %v1627_v4 = vadd.f32 %v3305_v54, %v3321_v52 }
 0x29c   : > { %v1579_v35 = vadd.f32 %v1578_v24, %v3313_v33  ;;  %v1766_v24 = vmax.f32 %v1566_v10, 0.0 }
 0x29d   : > { %v1805_v32 = vmax.f32 %v1550_v43, 0.0  ;;  %v1831_v43 = vpack.c.bf16 %v1782_v37, %v1774_v14 }
 0x29e   : > { %v3317_v19 = vpop.f32.mrf.mxu2  ;;  %v1806_v29 = vmax.f32 %v1579_v35, 0.0  ;;  %v1757_v35 = vmax.f32 %v1535_v20, 0.0  ;;  %v1624_v20 = vadd.f32 %v3301_v60, %v3338_v45  ;;  %v1760_v60 = vmax.f32 %v1622_v23, 0.0 }
 0x29f   : > { %v3319_v7 = vpop.f32.mrf.mxu3 }
 0x2a0   : > { %v1822_v39 = vpack.c.bf16 %v1765_v26, %v1757_v35 }
 0x2a2   : > { %v1551_v34 = vpop.f32.mrf.mxu0 }
 0x2a3   : > { %v1552_v9 = vadd.f32 %v1551_v34, %v3309_v13  ;;  %v1580_v40 = vpop.f32.mrf.mxu1 }
 0x2a4   : > { %v1581_v3 = vadd.f32 %v1580_v40, %v3309_v13 }
 0x2a5   : > { %v1813_v47 = vmax.f32 %v1552_v9, 0.0  ;;  %v1823_v9 = vpack.c.bf16 %v1766_v24, %v1758_v15 }
 0x2a6   : > { %v1604_v11 = vpop.f32.mrf.mxu2  ;;  %v1814_v46 = vmax.f32 %v1581_v3, 0.0  ;;  %v3362_v3 = vld [vmem:[%s3528_s5] sm:$0x3] }
 0x2a7   : > { %v1633_v8 = vpop.f32.mrf.mxu3  ;;  %v1846_v55 = vpack.c.bf16 %v1813_v47, %v1805_v32  ;;  %v1605_v0 = vadd.f32 %v1604_v11, %v3324_v59 }
 0x2a8   : > { %v1847_v25 = vpack.c.bf16 %v1814_v46, %v1806_v29  ;;  %v1634_v63 = vadd.f32 %v1633_v8, %v3324_v59  ;;  %v1603_v46 = vadd.f32 %v3317_v19, %v3315_v51  ;;  %v1600_v8 = vadd.f32 %v3307_v49, %v3332_v31 }
 0x2a9   : > { %1867 = vmatpush.bf16.msra.mxu0 %v1846_v55  ;;  %v1632_v55 = vadd.f32 %v3319_v7, %v3315_v51  ;;  %v1799_v57 = vmax.f32 %v1605_v0, 0.0  ;;  %v1629_v19 = vadd.f32 %v3311_v27, %v3332_v31  ;;  %v1598_v7 = vadd.f32 %v3303_v48, %v3321_v52 }
 0x2aa   : > { %1880 = vmatpush.bf16.msra.mxu1 %v1847_v25  ;;  %v1800_v5 = vmax.f32 %v1634_v63, 0.0  ;;  %v1791_v6 = vmax.f32 %v1603_v46, 0.0  ;;  %v1783_v10 = vmax.f32 %v1600_v8, 0.0 }
 0x2ab   : > { %v3341_v2 = vpop.f32.mrf.mxu0  ;;  %v1792_v49 = vmax.f32 %v1632_v55, 0.0  ;;  %v1784_v48 = vmax.f32 %v1629_v19, 0.0  ;;  %v1775_v54 = vmax.f32 %v1598_v7, 0.0 }
 0x2ac   : > { %v3344_v38 = vpop.f32.mrf.mxu1  ;;  %v1840_v37 = vpack.c.bf16 %v1799_v57, %v1791_v6 }
 0x2ad   : > { %1868 = vmatpush.bf16.msra.mxu0 %v1838_v36  ;;  %v1595_v36 = vadd.f32 %v3299_v50, %v3338_v45  ;;  %v1841_v22 = vpack.c.bf16 %v1800_v5, %v1792_v49  ;;  %v1776_v50 = vmax.f32 %v1627_v4, 0.0 }
 0x2ae   : > { %v1607_v1 = vpop.f32.mrf.mxu2  ;;  %1881 = vmatpush.bf16.msra.mxu1 %v1839_v17 }
 0x2af   : > { %v1636_v18 = vpop.f32.mrf.mxu3  ;;  %v1608_v40 = vadd.f32 %v1607_v1, %v3313_v33  ;;  %v1593_v1 = vadd.f32 %v3295_v16, %v3346_v42  ;;  %v1767_v14 = vmax.f32 %v1595_v36, 0.0  ;;  %v1833_v24 = vpack.c.bf16 %v1784_v48, %v1776_v50 }
 0x2b0   : > { %v1637_v56 = vadd.f32 %v1636_v18, %v3313_v33  ;;  %v1832_v18 = vpack.c.bf16 %v1783_v10, %v1775_v54 }
 0x2b1   : > { %1869 = vmatpush.bf16.msra.mxu0 %v1830_v30  ;;  %v1807_v53 = vmax.f32 %v1608_v40, 0.0  ;;  %v1768_v30 = vmax.f32 %v1624_v20, 0.0  ;;  %v1759_v35 = vmax.f32 %v1593_v1, 0.0 }
 0x2b2   : > { %1882 = vmatpush.bf16.msra.mxu1 %v1831_v43  ;;  %v1808_v11 = vmax.f32 %v1637_v56, 0.0 }
 0x2b3   : > { %v3353_v34 = vpop.f32.mrf.mxu0  ;;  %v1824_v15 = vpack.c.bf16 %v1767_v14, %v1759_v35 }
 0x2b4   : > { %v3355_v44 = vpop.f32.mrf.mxu1 }
 0x2b5   : > { %1870 = vmatpush.bf16.msra.mxu0 %v1822_v39 }
 0x2b6   : > { %v1609_v61 = vpop.f32.mrf.mxu2  ;;  %1883 = vmatpush.bf16.msra.mxu1 %v1823_v9  ;;  %v1825_v9 = vpack.c.bf16 %v1768_v30, %v1760_v60 }
 0x2b7   : > { %v1610_v32 = vadd.f32 %v1609_v61, %v3309_v13  ;;  %v1638_v47 = vpop.f32.mrf.mxu3 }
 0x2b8   : > { %v1639_v29 = vadd.f32 %v1638_v47, %v3309_v13  ;;  %2235 = vmatmul.msk.bf16.vlgmr.msra.gmra.mxu0 %vm1094_vm1, %v3362_v3 }
 0x2b9   : > { %v1815_v12 = vmax.f32 %v1610_v32, 0.0  ;;  %2236 = vmatmul.msk.bf16.vlgmr.msra.gmra.mxu1 %vm1094_vm1, %v3362_v3 }
 0x2ba   : > { %v1816_v58 = vmax.f32 %v1639_v29, 0.0 }
 0x2bb   : > { %v1848_v25 = vpack.c.bf16 %v1815_v12, %v1807_v53  ;;  %v3378_v41 = vpop.f32.mrf.mxu0 }
 0x2bc   : > { %v1849_v62 = vpack.c.bf16 %v1816_v58, %v1808_v11  ;;  %v3382_v28 = vpop.f32.mrf.mxu1  ;;  %v1656_v50 = vadd.f32 %v3378_v41, %v3321_v52  ;;  %v1651_v41 = vadd.f32 %v3341_v2, %v3346_v42 }
 0x2bd   : > { %1893 = vmatpush.bf16.msra.mxu2 %v1848_v25 }
 0x2be   : > { %1906 = vmatpush.bf16.msra.mxu3 %v1849_v62 }
 0x2bf   : > { %v3390_v27 = vpop.f32.mrf.mxu2  ;;  %v3392_v17 = vpop.f32.mrf.mxu3 }
 0x2c1   : > { %1894 = vmatpush.bf16.msra.mxu2 %v1840_v37 }
 0x2c2   : > { %1907 = vmatpush.bf16.msra.mxu3 %v1841_v22 }
 0x2c3   : > { %v1657_v26 = vpop.f32.mrf.mxu0 }
 0x2c4   : > { %v1686_v43 = vpop.f32.mrf.mxu1  ;;  %v1658_v20 = vadd.f32 %v1657_v26, %v3332_v31 }
 0x2c5   : > { %1895 = vmatpush.bf16.msra.mxu2 %v1832_v18  ;;  %v1687_v1 = vadd.f32 %v1686_v43, %v3332_v31  ;;  %v1685_v18 = vadd.f32 %v3382_v28, %v3321_v52  ;;  %v1682_v43 = vadd.f32 %v3355_v44, %v3338_v45  ;;  %v1680_v28 = vadd.f32 %v3344_v38, %v3346_v42 }
 0x2c6   : > { %1908 = vmatpush.bf16.msra.mxu3 %v1833_v24  ;;  %v1653_v24 = vadd.f32 %v3353_v34, %v3338_v45  ;;  %v1785_v26 = vmax.f32 %v1658_v20, 0.0 }
 0x2c7   : > { %v3400_v39 = vpop.f32.mrf.mxu2  ;;  %v3402_v16 = vpop.f32.mrf.mxu3  ;;  %v1786_v60 = vmax.f32 %v1687_v1, 0.0  ;;  %v1762_v44 = vmax.f32 %v1680_v28, 0.0 }
 0x2c8   : > { %v1769_v34 = vmax.f32 %v1653_v24, 0.0 }
 0x2c9   : > { %1896 = vmatpush.bf16.msra.mxu2 %v1824_v15 }
 0x2ca   : > { %1909 = vmatpush.bf16.msra.mxu3 %v1825_v9  ;;  %v1777_v9 = vmax.f32 %v1656_v50, 0.0 }
 0x2cb   : > { %v1660_v21 = vpop.f32.mrf.mxu0 }
 0x2cc   : > { %v1689_v40 = vpop.f32.mrf.mxu1  ;;  %2237 = vmatmul.msk.bf16.vlgmr.msra.gmra.mxu2 %vm1094_vm1, %v3362_v3  ;;  %v1661_v62 = vadd.f32 %v1660_v21, %v3315_v51  ;;  %v1778_v21 = vmax.f32 %v1685_v18, 0.0 }
 0x2cd   : > { %2238 = vmatmul.msk.bf16.vlgmr.msra.gmra.mxu3 %vm1094_vm1, %v3362_v3  ;;  %v1690_v4 = vadd.f32 %v1689_v40, %v3315_v51 }
 0x2ce   : > { %v1793_v14 = vmax.f32 %v1661_v62, 0.0 }
 0x2cf   : > { %v3408_v56 = vpop.f32.mrf.mxu2  ;;  %v3410_v61 = vpop.f32.mrf.mxu3  ;;  %v1794_v30 = vmax.f32 %v1690_v4, 0.0 }
 0x2d0   : > { %v1743_v20 = vadd.f32 %v3410_v61, %v3321_v52 }
 0x2d2   : > { %v1780_v50 = vmax.f32 %v1743_v20, 0.0 }
 0x2d3   : > { %v1662_v0 = vpop.f32.mrf.mxu0 }
 0x2d4   : > { %v1691_v32 = vpop.f32.mrf.mxu1  ;;  %v1663_v8 = vadd.f32 %v1662_v0, %v3324_v59 }
 0x2d5   : > { %v1692_v19 = vadd.f32 %v1691_v32, %v3324_v59  ;;  %v1834_v32 = vpack.c.bf16 %v1785_v26, %v1777_v9 }
 0x2d6   : > { %v1801_v48 = vmax.f32 %v1663_v8, 0.0 }
 0x2d7   : > { %v3412_v47 = vpop.f32.mrf.mxu2  ;;  %v3414_v63 = vpop.f32.mrf.mxu3  ;;  %v1802_v54 = vmax.f32 %v1692_v19, 0.0 }
 0x2d8   : > { %v1842_v35 = vpack.c.bf16 %v1801_v48, %v1793_v14 }
 0x2d9   : > { %v1843_v15 = vpack.c.bf16 %v1802_v54, %v1794_v30 }
 0x2db   : > { %v1665_v29 = vpop.f32.mrf.mxu0 }
 0x2dc   : > { %v1694_v46 = vpop.f32.mrf.mxu1  ;;  %v1666_v55 = vadd.f32 %v1665_v29, %v3313_v33  ;;  %v1770_v29 = vmax.f32 %v1682_v43, 0.0 }
 0x2dd   : > { %v1695_v11 = vadd.f32 %v1694_v46, %v3313_v33  ;;  %v1835_v46 = vpack.c.bf16 %v1786_v60, %v1778_v21 }
 0x2de   : > { %v1809_v7 = vmax.f32 %v1666_v55, 0.0  ;;  %v1761_v55 = vmax.f32 %v1651_v41, 0.0 }
 0x2df   : > { %v3416_v53 = vpop.f32.mrf.mxu2  ;;  %v3418_v12 = vpop.f32.mrf.mxu3  ;;  %v1810_v49 = vmax.f32 %v1695_v11, 0.0 }
 0x2e0   : > { %v1826_v11 = vpack.c.bf16 %v1769_v34, %v1761_v55 }
 0x2e3   : > { %v1667_v58 = vpop.f32.mrf.mxu0 }
 0x2e4   : > { %v1668_v57 = vadd.f32 %v1667_v58, %v3309_v13  ;;  %v1696_v25 = vpop.f32.mrf.mxu1  ;;  %v1827_v58 = vpack.c.bf16 %v1770_v29, %v1762_v44 }
 0x2e5   : > { %v1697_v5 = vadd.f32 %v1696_v25, %v3309_v13 }
 0x2e6   : > { %v1817_v6 = vmax.f32 %v1668_v57, 0.0 }
 0x2e7   : > { %v1818_v36 = vmax.f32 %v1697_v5, 0.0  ;;  %v1720_v10 = vpop.f32.mrf.mxu2  ;;  %v1749_v37 = vpop.f32.mrf.mxu3 }
 0x2e8   : > { %v1850_v22 = vpack.c.bf16 %v1817_v6, %v1809_v7  ;;  %v1721_v25 = vadd.f32 %v1720_v10, %v3324_v59  ;;  %v1750_v19 = vadd.f32 %v1749_v37, %v3324_v59  ;;  %v1719_v7 = vadd.f32 %v3416_v53, %v3315_v51 }
 0x2e9   : > { %v1851_v23 = vpack.c.bf16 %v1818_v36, %v1810_v49  ;;  %v1748_v6 = vadd.f32 %v3418_v12, %v3315_v51  ;;  %v1716_v59 = vadd.f32 %v3412_v47, %v3332_v31  ;;  %v1714_v12 = vadd.f32 %v3408_v56, %v3321_v52 }
 0x2ea   : > { %1919 = vmatpush.bf16.msrb.mxu0 %v1850_v22  ;;  %v1803_v53 = vmax.f32 %v1721_v25, 0.0  ;;  %v1804_v10 = vmax.f32 %v1750_v19, 0.0  ;;  %v1795_v48 = vmax.f32 %v1719_v7, 0.0  ;;  %v1711_v47 = vadd.f32 %v3400_v39, %v3338_v45 }
 0x2eb   : > { %1932 = vmatpush.bf16.msrb.mxu1 %v1851_v23  ;;  %v1796_v22 = vmax.f32 %v1748_v6, 0.0  ;;  %v1709_v56 = vadd.f32 %v3390_v27, %v3346_v42  ;;  %v1738_v52 = vadd.f32 %v3392_v17, %v3346_v42  ;;  %v1779_v61 = vmax.f32 %v1714_v12, 0.0  ;;  %v1858_v27 = vpop.permute.xlu0 %1857 }
 0x2ec   : > { %v1844_v54 = vpack.c.bf16 %v1803_v53, %v1795_v48  ;;  %v1771_v14 = vmax.f32 %v1711_v47, 0.0 }
 0x2ed   : > { %v1845_v23 = vpack.c.bf16 %v1804_v10, %v1796_v22  ;;  %v1764_v30 = vmax.f32 %v1738_v52, 0.0 }
 0x2ee   : > { %1920 = vmatpush.bf16.msrb.mxu0 %v1842_v35 }
 0x2ef   : > { %v1723_v40 = vpop.f32.mrf.mxu2  ;;  %v1752_v0 = vpop.f32.mrf.mxu3  ;;  %1933 = vmatpush.bf16.msrb.mxu1 %v1843_v15 }
 0x2f0   : > { %v1724_v2 = vadd.f32 %v1723_v40, %v3313_v33  ;;  %v1753_v8 = vadd.f32 %v1752_v0, %v3313_v33 }
 0x2f2   : > { %1921 = vmatpush.bf16.msrb.mxu0 %v1834_v32  ;;  %v1811_v33 = vmax.f32 %v1724_v2, 0.0  ;;  %v1812_v4 = vmax.f32 %v1753_v8, 0.0 }
 0x2f3   : > { %1934 = vmatpush.bf16.msrb.mxu1 %v1835_v46 }
 0x2f6   : > { %1922 = vmatpush.bf16.msrb.mxu0 %v1826_v11 }
 0x2f7   : > { %v1725_v38 = vpop.f32.mrf.mxu2  ;;  %v1754_v57 = vpop.f32.mrf.mxu3  ;;  %1935 = vmatpush.bf16.msrb.mxu1 %v1827_v58 }
 0x2f8   : > { %v1726_v5 = vadd.f32 %v1725_v38, %v3309_v13  ;;  %v1755_v62 = vadd.f32 %v1754_v57, %v3309_v13  ;;  %v1745_v13 = vadd.f32 %v3414_v63, %v3332_v31  ;;  %v1740_v31 = vadd.f32 %v3402_v16, %v3338_v45 }
 0x2f9   : > { %2239 = vmatmul.msk.bf16.vlgmr.msrb.gmra.mxu0 %vm1094_vm1, %v3362_v3  ;;  %v1787_v63 = vmax.f32 %v1716_v59, 0.0  ;;  %v1763_v16 = vmax.f32 %v1709_v56, 0.0 }
 0x2fa   : > { %v1819_v49 = vmax.f32 %v1726_v5, 0.0  ;;  %v1820_v36 = vmax.f32 %v1755_v62, 0.0  ;;  %2240 = vmatmul.msk.bf16.vlgmr.msrb.gmra.mxu1 %vm1094_vm1, %v3362_v3  ;;  %v1788_v1 = vmax.f32 %v1745_v13, 0.0  ;;  %v1772_v39 = vmax.f32 %v1740_v31, 0.0 }
 0x2fb   : > { %v1836_v18 = vpack.c.bf16 %v1787_v63, %v1779_v61  ;;  %v1828_v24 = vpack.c.bf16 %v1771_v14, %v1763_v16 }
 0x2fc   : > { %v1852_v37 = vpack.c.bf16 %v1819_v49, %v1811_v33  ;;  %v1853_v51 = vpack.c.bf16 %v1820_v36, %v1812_v4  ;;  %v1837_v45 = vpack.c.bf16 %v1788_v1, %v1780_v50  ;;  %v1829_v26 = vpack.c.bf16 %v1772_v39, %v1764_v30 }
 0x2fe   : > { %1945 = vmatpush.bf16.msrb.mxu2 %v1852_v37  ;;  %1958 = vmatpush.bf16.msrb.mxu3 %v1853_v51 }
 0x302   : > { %1946 = vmatpush.bf16.msrb.mxu2 %v1844_v54  ;;  %1959 = vmatpush.bf16.msrb.mxu3 %v1845_v23 }
 0x306   : > { %1947 = vmatpush.bf16.msrb.mxu2 %v1836_v18  ;;  %1960 = vmatpush.bf16.msrb.mxu3 %v1837_v45 }
 0x30a   : > { %1948 = vmatpush.bf16.msrb.mxu2 %v1828_v24  ;;  %1961 = vmatpush.bf16.msrb.mxu3 %v1829_v26 }
 0x30d   : > { %2241 = vmatmul.msk.bf16.vlgmr.msrb.gmra.mxu2 %vm1094_vm1, %v3362_v3  ;;  %2242 = vmatmul.msk.bf16.vlgmr.msrb.gmra.mxu3 %vm1094_vm1, %v3362_v3 }
 0x335   : > { %v1872_v42 = vpop.f32.mrf.mxu0 }
 0x336   : > { %v1885_v17 = vpop.f32.mrf.mxu1  ;;  %v1873_v43 = vadd.f32 %v1872_v42, %v1858_v27 }
 0x337   : > { %v1886_v35 = vadd.f32 %v1885_v17, %v1858_v27 }
 0x339   : > { %v1975_v60 = vrot.slane %v1886_v35, 4 }
 0x33b   : > { %v1980_v15 = vsel %vm1979_vm2, %v1873_v43, %v1975_v60 }
 0x33c   : > { %1988 = vst [vmem:[%s3480_s15] sm:$0xff] %v1980_v15 }
 0x33d   : > { %v1874_v41 = vpop.f32.mrf.mxu0 }
 0x33e   : > { %v1887_v9 = vpop.f32.mrf.mxu1 }
 0x34f   : > { %v1898_v3 = vpop.f32.mrf.mxu2 }
 0x350   : > { %v1911_v28 = vpop.f32.mrf.mxu3  ;;  %v1899_v40 = vadd.f32 %v1898_v3, %v1858_v27 }
 0x351   : > { %v1912_v21 = vadd.f32 %v1911_v28, %v1858_v27 }
 0x353   : > { %v1976_v0 = vrot.slane %v1912_v21, 4 }
 0x355   : > { %v1981_v34 = vsel %vm1979_vm2, %v1899_v40, %v1976_v0 }
 0x356   : > { %1989 = vst [vmem:[%s3480_s15 + $0x8] sm:$0xff] %v1981_v34 }
 0x357   : > { %v1900_v32 = vpop.f32.mrf.mxu2 }
 0x358   : > { %v1913_v29 = vpop.f32.mrf.mxu3 }
 0x376   : > { %v1924_v46 = vpop.f32.mrf.mxu0 }
 0x377   : > { %v1937_v55 = vpop.f32.mrf.mxu1  ;;  %v1925_v11 = vadd.f32 %v1924_v46, %v1858_v27 }
 0x378   : > { %v1938_v44 = vadd.f32 %v1937_v55, %v1858_v27 }
 0x37a   : > { %v1977_v58 = vrot.slane %v1938_v44, 4 }
 0x37c   : > { %v1982_v2 = vsel %vm1979_vm2, %v1925_v11, %v1977_v58 }
 0x37d   : > { %1990 = vst [vmem:[%s3480_s15 + $0x10] sm:$0xff] %v1982_v2 }
 0x37e   : > { %v1926_v8 = vpop.f32.mrf.mxu0 }
 0x37f   : > { %v1939_v38 = vpop.f32.mrf.mxu1 }
 0x390   : > { %v1950_v57 = vpop.f32.mrf.mxu2  ;;  %v1963_v25 = vpop.f32.mrf.mxu3 }
 0x391   : > { %v1964_v19 = vadd.f32 %v1963_v25, %v1858_v27  ;;  %v1951_v5 = vadd.f32 %v1950_v57, %v1858_v27 }
 0x393   : > { %v1978_v62 = vrot.slane %v1964_v19, 4 }
 0x395   : > { %v1983_v7 = vsel %vm1979_vm2, %v1951_v5, %v1978_v62 }
 0x396   : > { %1991 = vst [vmem:[%s3480_s15 + $0x18] sm:$0xff] %v1983_v7 }
 0x397   : > { %2331 = shalt.err (!%p2328_p3)
}
 0x398   : > { %2261 = dma.vmem_to_hbm [thread:$0]  (%p2447_p5), %s2007_s20, 512, %s2009_s21, %s1993_s22   ;;  %v1952_v6 = vpop.f32.mrf.mxu2  ;;  %v1965_v33 = vpop.f32.mrf.mxu3 }
 0x399 PF: > { %p2267_p4 = scmp.ge.s32.totalorder %s2366_s27, 2  ;;  %s2020_s13 = sand.u32 1, %s2354_s24  }
 0x39a   : > { %s2021_s15 = scalar_lea.sflag [#allocation3], %s2020_s13 }
 0x39b   : > { %p2264_p7 = pnand %p2267_p4, %p2451_p6 }
 0x39d   : > { %p2265_p8 = pneg %p2264_p7 }
 0x39f   : > { %2349 = dma.done.wait (%p2265_p8), %s2021_s15, 512  }
 0x3a0   : > { %2351 = vsyncadd (%p2265_p8), %s2021_s15, 4294966784  ;;  %p17_p5 = scmp.ge.s32.totalorder %s2434_s30, 4   ;;  %s3533_s24 = smov %s2358_s25 }
 0x3a1   : > { %s3534_s25 = smov %s2362_s26  ;;  %s3535_s26 = smov %s2445_s10 }
 0x3a2   : > { %s3536_s27 = smov %s2434_s30  ;;  %19 = sbr.rel (!%p17_p5) target bundleno = 3 (0x3), region = 85 }
 0x3a7   :  { %2027 = vsyncpa [#allocation3], 1 }
 0x3a8   :  { %2029 = vsyncpa [#allocation3 + $0x1], 1 }

</bundles_post_ra>
